<compile_context>
chip_gen: v7x
topology: tpu7x:2x2x1
jax: 0.10.0
libtpu: 0.0.40
codegen_flags: <defaults>
</compile_context>

<pallas_src>
import math
import functools

import jax
import jax.numpy as jnp
from jax import lax
from jax.experimental import pallas as pl
from jax.experimental.pallas import tpu as pltpu

_VMEM_LIMIT = 32 * 1024 * 1024   # explicit scoped-VMEM limit; safe on v5e/v6e/v7x
_EPS = 1e-5


def _compiler_params(*sem):
    return pltpu.CompilerParams(dimension_semantics=sem,
                                vmem_limit_bytes=_VMEM_LIMIT)


# ------------------------------ tile pickers -------------------------------

def _pick_row_tile(rows, preferred=256):
    """Largest multiple-of-8 divisor of `rows` <= preferred (or full rows)."""
    if rows <= 8 or rows % 8 != 0:
        return rows
    t = min(preferred, rows)
    t -= t % 8
    while t > 8 and rows % t != 0:
        t -= 8
    if rows % t != 0:
        return rows
    # If one tile would cover everything, split in two so both v7x TensorCores
    # get work (free on single-TC v5e/v6e).
    if t == rows and (rows // 2) % 8 == 0:
        t = rows // 2
    return t


def _pick_col_tile(cols, preferred=512):
    """Largest multiple-of-128 divisor of `cols` <= preferred (or full cols)."""
    if cols <= 128 or cols % 128 != 0:
        return cols
    t = min(preferred, cols)
    t -= t % 128
    while t > 128 and cols % t != 0:
        t -= 128
    if cols % t != 0:
        return cols
    return t


# -------------------- fused MHA + residual + LayerNorm ---------------------

def _mha_ln_kernel(x_ref, kv_ref, wq_ref, wk_ref, wv_ref, wo_ref,
                   bq_ref, bk_ref, bv_ref, bo_ref, g_ref, be_ref,
                   *rest, nhead, scale, eps, has_mask):
    if has_mask:
        m_ref, o_ref = rest
    else:
        (o_ref,) = rest

    x = x_ref[0]          # [Lq, E]  (query + residual)
    kv = kv_ref[0]        # [Lk, E]

    q = jnp.dot(x, wq_ref[...], preferred_element_type=jnp.float32) + bq_ref[...]
    k = jnp.dot(kv, wk_ref[...], preferred_element_type=jnp.float32) + bk_ref[...]
    v = jnp.dot(kv, wv_ref[...], preferred_element_type=jnp.float32) + bv_ref[...]
    wo = wo_ref[...]      # [E, E] (pre-transposed out-proj)

    dh = x.shape[-1] // nhead
    acc = jnp.zeros(x.shape, jnp.float32)
    for h in range(nhead):                      # static unroll over heads
        lo, hi = h * dh, (h + 1) * dh
        s = lax.dot_general(q[:, lo:hi], k[:, lo:hi],
                            (((1,), (1,)), ((), ())),
                            preferred_element_type=jnp.float32) * scale
        if has_mask:
            s = s + m_ref[...]
        s = s - jnp.max(s, axis=-1, keepdims=True)
        p = jnp.exp(s)
        p = p * pl.reciprocal(jnp.sum(p, axis=-1, keepdims=True), approx=True)
        ctx = jnp.dot(p, v[:, lo:hi], preferred_element_type=jnp.float32)
        # concat-heads + out-proj == sum over heads of ctx_h @ WoT[h-rows]
        acc = acc + jnp.dot(ctx, wo[lo:hi, :], preferred_element_type=jnp.float32)

    y = x + acc + bo_ref[...]                   # residual + out-proj bias
    mu = jnp.mean(y, axis=-1, keepdims=True)
    d = y - mu
    var = jnp.mean(d * d, axis=-1, keepdims=True)
    o_ref[0] = d * lax.rsqrt(var + eps) * g_ref[...] + be_ref[...]


def mha_block(x, kv, attn_p, ln_p, nhead, mask=None):
    """x:[B,Lq,E], kv:[B,Lk,E] -> LayerNorm(x + MHA(x, kv, kv)) : [B,Lq,E]."""
    B, Lq, E = x.shape
    Lk = kv.shape[1]
    scale = 1.0 / math.sqrt(E // nhead)
    has_mask = mask is not None

    full = lambda b: (0, 0)
    in_specs = [
        pl.BlockSpec((1, Lq, E), lambda b: (b, 0, 0)),
        pl.BlockSpec((1, Lk, E), lambda b: (b, 0, 0)),
        pl.BlockSpec((E, E), full), pl.BlockSpec((E, E), full),
        pl.BlockSpec((E, E), full), pl.BlockSpec((E, E), full),
        pl.BlockSpec((1, E), full), pl.BlockSpec((1, E), full),
        pl.BlockSpec((1, E), full), pl.BlockSpec((1, E), full),
        pl.BlockSpec((1, E), full), pl.BlockSpec((1, E), full),
    ]
    args = [x, kv,
            attn_p["wqT"], attn_p["wkT"], attn_p["wvT"], attn_p["woT"],
            attn_p["bq"], attn_p["bk"], attn_p["bv"], attn_p["bo"],
            ln_p["gamma"], ln_p["beta"]]
    if has_mask:
        in_specs.append(pl.BlockSpec((Lq, Lk), full))
        args.append(mask)

    return pl.pallas_call(
        functools.partial(_mha_ln_kernel, nhead=nhead, scale=scale,
                          eps=_EPS, has_mask=has_mask),
        out_shape=jax.ShapeDtypeStruct((B, Lq, E), jnp.float32),
        grid=(B,),
        in_specs=in_specs,
        out_specs=pl.BlockSpec((1, Lq, E), lambda b: (b, 0, 0)),
        compiler_params=_compiler_params("parallel"),
    )(*args)


# -------------------- fused FFN + residual + LayerNorm ---------------------

def _ffn_ln_kernel(x_ref, w1_ref, b1_ref, w2_ref, b2_ref, g_ref, be_ref,
                   o_ref, *, eps):
    x = x_ref[...]
    h = jnp.dot(x, w1_ref[...], preferred_element_type=jnp.float32) + b1_ref[...]
    h = jnp.maximum(h, 0.0)
    y = x + jnp.dot(h, w2_ref[...], preferred_element_type=jnp.float32) + b2_ref[...]
    mu = jnp.mean(y, axis=-1, keepdims=True)
    d = y - mu
    var = jnp.mean(d * d, axis=-1, keepdims=True)
    o_ref[...] = d * lax.rsqrt(var + eps) * g_ref[...] + be_ref[...]


def ffn_block(x, ff_p, ln_p):
    B, L, E = x.shape
    N = B * L
    F = ff_p["w1T"].shape[1]
    x2 = x.reshape(N, E)
    tm = _pick_row_tile(N)
    full = lambda i: (0, 0)
    out = pl.pallas_call(
        functools.partial(_ffn_ln_kernel, eps=_EPS),
        out_shape=jax.ShapeDtypeStruct((N, E), jnp.float32),
        grid=(N // tm,),
        in_specs=[
            pl.BlockSpec((tm, E), lambda i: (i, 0)),
            pl.BlockSpec((E, F), full), pl.BlockSpec((1, F), full),
            pl.BlockSpec((F, E), full), pl.BlockSpec((1, E), full),
            pl.BlockSpec((1, E), full), pl.BlockSpec((1, E), full),
        ],
        out_specs=pl.BlockSpec((tm, E), lambda i: (i, 0)),
        compiler_params=_compiler_params("parallel"),
    )(x2, ff_p["w1T"], ff_p["b1"], ff_p["w2T"], ff_p["b2"],
      ln_p["gamma"], ln_p["beta"])
    return out.reshape(B, L, E)


# ------------------------- standalone LayerNorm -----------------------------

def _ln_kernel(x_ref, g_ref, b_ref, o_ref, *, eps):
    x = x_ref[...]
    mu = jnp.mean(x, axis=-1, keepdims=True)
    d = x - mu
    var = jnp.mean(d * d, axis=-1, keepdims=True)
    o_ref[...] = d * lax.rsqrt(var + eps) * g_ref[...] + b_ref[...]


def layer_norm(x, ln_p):
    B, L, E = x.shape
    N = B * L
    x2 = x.reshape(N, E)
    tm = _pick_row_tile(N)
    out = pl.pallas_call(
        functools.partial(_ln_kernel, eps=_EPS),
        out_shape=jax.ShapeDtypeStruct((N, E), jnp.float32),
        grid=(N // tm,),
        in_specs=[pl.BlockSpec((tm, E), lambda i: (i, 0)),
                  pl.BlockSpec((1, E), lambda i: (0, 0)),
                  pl.BlockSpec((1, E), lambda i: (0, 0))],
        out_specs=pl.BlockSpec((tm, E), lambda i: (i, 0)),
        compiler_params=_compiler_params("parallel"),
    )(x2, ln_p["gamma"], ln_p["beta"])
    return out.reshape(B, L, E)


# ----------------- fused decoder-norm + fc_out projection -------------------

def _ln_linear_kernel(x_ref, g_ref, be_ref, w_ref, b_ref, o_ref, *, eps):
    x = x_ref[...]
    mu = jnp.mean(x, axis=-1, keepdims=True)
    d = x - mu
    var = jnp.mean(d * d, axis=-1, keepdims=True)
    xn = d * lax.rsqrt(var + eps) * g_ref[...] + be_ref[...]
    o_ref[...] = jnp.dot(xn, w_ref[...],
                         preferred_element_type=jnp.float32) + b_ref[...]


def final_norm_linear(x, ln_p, wT_pad, b_pad, vocab):
    """x:[B,T,E] -> logits [T, B, vocab]  (decoder_norm + fc_out fused)."""
    B, T, E = x.shape
    N = B * T
    Vpad = wT_pad.shape[1]
    x2 = x.reshape(N, E)
    tm = _pick_row_tile(N)
    tn = _pick_col_tile(Vpad)
    out = pl.pallas_call(
        functools.partial(_ln_linear_kernel, eps=_EPS),
        out_shape=jax.ShapeDtypeStruct((N, Vpad), jnp.float32),
        grid=(N // tm, Vpad // tn),
        in_specs=[
            pl.BlockSpec((tm, E), lambda i, j: (i, 0)),
            pl.BlockSpec((1, E), lambda i, j: (0, 0)),
            pl.BlockSpec((1, E), lambda i, j: (0, 0)),
            pl.BlockSpec((E, tn), lambda i, j: (0, j)),
            pl.BlockSpec((1, tn), lambda i, j: (0, j)),
        ],
        out_specs=pl.BlockSpec((tm, tn), lambda i, j: (i, j)),
        compiler_params=_compiler_params("parallel", "parallel"),
    )(x2, ln_p["gamma"], ln_p["beta"], wT_pad, b_pad)
    logits = out[:, :vocab].reshape(B, T, vocab)
    return logits.transpose(1, 0, 2)            # -> [T, B, vocab]


# ------------------------------- model glue --------------------------------

def positional_encoding_table(max_len, d_model):
    position = jnp.arange(max_len, dtype=jnp.float32)[:, None]
    div_term = jnp.exp(jnp.arange(0, d_model, 2, dtype=jnp.float32)
                       * (-math.log(10000.0) / d_model))
    pe = jnp.zeros((max_len, 1, d_model), jnp.float32)
    pe = pe.at[:, 0, 0::2].set(jnp.sin(position * div_term))
    pe = pe.at[:, 0, 1::2].set(jnp.cos(position * div_term))
    return pe


def generate_square_subsequent_mask(sz):
    # Exactly the reference: torch.triu(ones*-inf).transpose(0,1)
    # => mask[i, j] = -inf for j <= i (diagonal included), 0 otherwise.
    row = jnp.arange(sz)[:, None]
    col = jnp.arange(sz)[None, :]
    return jnp.where(col <= row, -jnp.inf, 0.0).astype(jnp.float32)


def embed(tokens, table, pe, d_model):
    # tokens [L, B] -> batch-first [B, L, E]; dropout = identity in eval.
    L = tokens.shape[0]
    x = jnp.take(table, tokens.T, axis=0) * math.sqrt(d_model)
    return x + pe[:L, 0, :][None]


def encoder_layer(x, p, nhead):
    # key-padding mask (src == None) is all-False -> no mask DMA'd at all.
    x = mha_block(x, x, p["self_attn"], p["norm1"], nhead, mask=None)
    x = ffn_block(x, p["ff"], p["norm2"])
    return x


def decoder_layer(y, memory, p, nhead, tgt_mask):
    y = mha_block(y, y, p["self_attn"], p["norm1"], nhead, mask=tgt_mask)
    y = mha_block(y, memory, p["cross_attn"], p["norm2"], nhead, mask=None)
    y = ffn_block(y, p["ff"], p["norm3"])
    return y


def transformer_forward(params, src, trg, *, d_model, nhead, vocab_trg):
    S = src.shape[0]
    T = trg.shape[0]
    pe = params["pe"]

    src_emb = embed(src, params["src_embed"], pe, d_model)   # [B, S, E]
    trg_emb = embed(trg, params["trg_embed"], pe, d_model)   # [B, T, E]

    tgt_mask = generate_square_subsequent_mask(T)

    x = src_emb
    for lp in params["encoder_layers"]:
        x = encoder_layer(x, lp, nhead)
    memory = layer_norm(x, params["encoder_norm"])

    y = trg_emb
    for lp in params["decoder_layers"]:
        y = decoder_layer(y, memory, lp, nhead, tgt_mask)

    # Reference calls self.transformer twice with identical args; eval mode is
    # deterministic, so one pass is semantically identical.
    # decoder final LayerNorm is fused into the fc_out kernel below.
    return final_norm_linear(y, params["decoder_norm"],
                             params["fc_out_wT"], params["fc_out_b"], vocab_trg)


# ------------------------------ parameters ---------------------------------

def init_params(key, vocab_src, vocab_trg, d_model, nhead, n_enc, n_dec, d_ff,
                max_len=5000):
    keys = iter(jax.random.split(key, 512))

    def nrm(shape, scale=0.02):
        return scale * jax.random.normal(next(keys), shape, dtype=jnp.float32)

    def ln():
        return {"gamma": jnp.ones((1, d_model), jnp.float32),
                "beta": jnp.zeros((1, d_model), jnp.float32)}

    def attn():
        # Weights stored pre-transposed ([in, out]) so kernels consume them
        # directly on the MXU — no per-call w.T HBM rewrite.
        return {"wqT": nrm((d_model, d_model)), "bq": nrm((1, d_model)),
                "wkT": nrm((d_model, d_model)), "bk": nrm((1, d_model)),
                "wvT": nrm((d_model, d_model)), "bv": nrm((1, d_model)),
                "woT": nrm((d_model, d_model)), "bo": nrm((1, d_model))}

    def ffn():
        return {"w1T": nrm((d_model, d_ff)), "b1": nrm((1, d_ff)),
                "w2T": nrm((d_ff, d_model)), "b2": nrm((1, d_model))}

    # fc_out: pre-transposed and zero-padded to a lane-dense vocab dim.
    vpad = ((vocab_trg + 127) // 128) * 128
    fc_wT = jnp.zeros((d_model, vpad), jnp.float32)
    fc_wT = fc_wT.at[:, :vocab_trg].set(nrm((d_model, vocab_trg)))
    fc_b = jnp.zeros((1, vpad), jnp.float32)
    fc_b = fc_b.at[:, :vocab_trg].set(nrm((1, vocab_trg)))

    return {
        "src_embed": nrm((vocab_src, d_model), 1.0),
        "trg_embed": nrm((vocab_trg, d_model), 1.0),
        "pe": positional_encoding_table(max_len, d_model),
        "encoder_layers": [
            {"self_attn": attn(), "ff": ffn(), "norm1": ln(), "norm2": ln()}
            for _ in range(n_enc)
        ],
        "decoder_layers": [
            {"self_attn": attn(), "cross_attn": attn(), "ff": ffn(),
             "norm1": ln(), "norm2": ln(), "norm3": ln()}
            for _ in range(n_dec)
        ],
        "encoder_norm": ln(),
        "decoder_norm": ln(),
        "fc_out_wT": fc_wT,
        "fc_out_b": fc_b,
    }


# --------------------------------- main -------------------------------------

if __name__ == "__main__":
    # Small, module-consistent shapes.
    d_model, nhead = 32, 4
    n_enc, n_dec, d_ff = 2, 2, 64
    vocab_sizes = {"src": 50, "trg": 48}
    S, T, B = 8, 8, 2

    key = jax.random.PRNGKey(0)
    pkey, skey, tkey = jax.random.split(key, 3)
    params = init_params(pkey, vocab_sizes["src"], vocab_sizes["trg"],
                         d_model, nhead, n_enc, n_dec, d_ff)

    src = jax.random.randint(skey, (S, B), 0, vocab_sizes["src"], dtype=jnp.int32)
    trg = jax.random.randint(tkey, (T, B), 0, vocab_sizes["trg"], dtype=jnp.int32)

    fwd = jax.jit(functools.partial(transformer_forward, d_model=d_model,
                                    nhead=nhead, vocab_trg=vocab_sizes["trg"]))
    out = fwd(params, src, trg)
    jax.block_until_ready(out)

    assert out.shape == (T, B, vocab_sizes["trg"]), out.shape
    print("KERNEL_OK")
</pallas_src>

<mosaic_0001>
module attributes {stable_mosaic.version = 11 : i64} {
  func.func @_mha_ln_kernel(%arg0: i32, %arg1: memref<1x8x32xf32, #tpu.memory_space<vmem>>, %arg2: memref<1x8x32xf32, #tpu.memory_space<vmem>>, %arg3: memref<32x32xf32, #tpu.memory_space<vmem>>, %arg4: memref<32x32xf32, #tpu.memory_space<vmem>>, %arg5: memref<32x32xf32, #tpu.memory_space<vmem>>, %arg6: memref<32x32xf32, #tpu.memory_space<vmem>>, %arg7: memref<1x32xf32, #tpu.memory_space<vmem>>, %arg8: memref<1x32xf32, #tpu.memory_space<vmem>>, %arg9: memref<1x32xf32, #tpu.memory_space<vmem>>, %arg10: memref<1x32xf32, #tpu.memory_space<vmem>>, %arg11: memref<1x32xf32, #tpu.memory_space<vmem>>, %arg12: memref<1x32xf32, #tpu.memory_space<vmem>>, %arg13: memref<1x8x32xf32, #tpu.memory_space<vmem>>) attributes {dimension_semantics = [#tpu.dimension_semantics<parallel>], iteration_bounds = array<i64: 2>, scalar_prefetch = 0 : i64, scratch_operands = 0 : i64, tpu.core_type = #tpu.core_type<tc>, window_params = [{transform_indices = @transform_0, window_bounds = array<i64: 1, 8, 32>}, {transform_indices = @transform_1, window_bounds = array<i64: 1, 8, 32>}, {pipeline_mode = #tpu.pipeline_mode<synchronous>, transform_indices = @transform_2, window_bounds = array<i64: 32, 32>}, {pipeline_mode = #tpu.pipeline_mode<synchronous>, transform_indices = @transform_3, window_bounds = array<i64: 32, 32>}, {pipeline_mode = #tpu.pipeline_mode<synchronous>, transform_indices = @transform_4, window_bounds = array<i64: 32, 32>}, {pipeline_mode = #tpu.pipeline_mode<synchronous>, transform_indices = @transform_5, window_bounds = array<i64: 32, 32>}, {pipeline_mode = #tpu.pipeline_mode<synchronous>, transform_indices = @transform_6, window_bounds = array<i64: 1, 32>}, {pipeline_mode = #tpu.pipeline_mode<synchronous>, transform_indices = @transform_7, window_bounds = array<i64: 1, 32>}, {pipeline_mode = #tpu.pipeline_mode<synchronous>, transform_indices = @transform_8, window_bounds = array<i64: 1, 32>}, {pipeline_mode = #tpu.pipeline_mode<synchronous>, transform_indices = @transform_9, window_bounds = array<i64: 1, 32>}, {pipeline_mode = #tpu.pipeline_mode<synchronous>, transform_indices = @transform_10, window_bounds = array<i64: 1, 32>}, {pipeline_mode = #tpu.pipeline_mode<synchronous>, transform_indices = @transform_11, window_bounds = array<i64: 1, 32>}, {transform_indices = @transform_12, window_bounds = array<i64: 1, 8, 32>}]} {
    %c0 = arith.constant 0 : index
    %c0_0 = arith.constant 0 : index
    %c0_1 = arith.constant 0 : index
    %0 = vector.load %arg1[%c0, %c0_0, %c0_1] : memref<1x8x32xf32, #tpu.memory_space<vmem>>, vector<1x8x32xf32>
    %1 = vector.shape_cast %0 : vector<1x8x32xf32> to vector<8x32xf32>
    %c0_2 = arith.constant 0 : index
    %c0_3 = arith.constant 0 : index
    %c0_4 = arith.constant 0 : index
    %2 = vector.load %arg2[%c0_2, %c0_3, %c0_4] : memref<1x8x32xf32, #tpu.memory_space<vmem>>, vector<1x8x32xf32>
    %3 = vector.shape_cast %2 : vector<1x8x32xf32> to vector<8x32xf32>
    %c0_5 = arith.constant 0 : index
    %c0_6 = arith.constant 0 : index
    %4 = vector.load %arg3[%c0_5, %c0_6] : memref<32x32xf32, #tpu.memory_space<vmem>>, vector<32x32xf32>
    %cst = arith.constant dense<0.000000e+00> : vector<8x32xf32>
    %5 = tpu.matmul %1, %4, %cst {dimension_numbers = #tpu.dot_dimension_numbers<[1], [0], [0], [1], [0, 0, 1, 1], [], []>} : vector<8x32xf32>, vector<32x32xf32>, vector<8x32xf32> -> vector<8x32xf32>
    %c0_7 = arith.constant 0 : index
    %c0_8 = arith.constant 0 : index
    %6 = vector.load %arg7[%c0_7, %c0_8] : memref<1x32xf32, #tpu.memory_space<vmem>>, vector<1x32xf32>
    %7 = vector.broadcast %6 : vector<1x32xf32> to vector<8x32xf32>
    %8 = arith.addf %5, %7 : vector<8x32xf32>
    %c0_9 = arith.constant 0 : index
    %c0_10 = arith.constant 0 : index
    %9 = vector.load %arg4[%c0_9, %c0_10] : memref<32x32xf32, #tpu.memory_space<vmem>>, vector<32x32xf32>
    %cst_11 = arith.constant dense<0.000000e+00> : vector<8x32xf32>
    %10 = tpu.matmul %3, %9, %cst_11 {dimension_numbers = #tpu.dot_dimension_numbers<[1], [0], [0], [1], [0, 0, 1, 1], [], []>} : vector<8x32xf32>, vector<32x32xf32>, vector<8x32xf32> -> vector<8x32xf32>
    %c0_12 = arith.constant 0 : index
    %c0_13 = arith.constant 0 : index
    %11 = vector.load %arg8[%c0_12, %c0_13] : memref<1x32xf32, #tpu.memory_space<vmem>>, vector<1x32xf32>
    %12 = vector.broadcast %11 : vector<1x32xf32> to vector<8x32xf32>
    %13 = arith.addf %10, %12 : vector<8x32xf32>
    %c0_14 = arith.constant 0 : index
    %c0_15 = arith.constant 0 : index
    %14 = vector.load %arg5[%c0_14, %c0_15] : memref<32x32xf32, #tpu.memory_space<vmem>>, vector<32x32xf32>
    %cst_16 = arith.constant dense<0.000000e+00> : vector<8x32xf32>
    %15 = tpu.matmul %3, %14, %cst_16 {dimension_numbers = #tpu.dot_dimension_numbers<[1], [0], [0], [1], [0, 0, 1, 1], [], []>} : vector<8x32xf32>, vector<32x32xf32>, vector<8x32xf32> -> vector<8x32xf32>
    %c0_17 = arith.constant 0 : index
    %c0_18 = arith.constant 0 : index
    %16 = vector.load %arg9[%c0_17, %c0_18] : memref<1x32xf32, #tpu.memory_space<vmem>>, vector<1x32xf32>
    %17 = vector.broadcast %16 : vector<1x32xf32> to vector<8x32xf32>
    %18 = arith.addf %15, %17 : vector<8x32xf32>
    %c0_19 = arith.constant 0 : index
    %c0_20 = arith.constant 0 : index
    %19 = vector.load %arg6[%c0_19, %c0_20] : memref<32x32xf32, #tpu.memory_space<vmem>>, vector<32x32xf32>
    %cst_21 = arith.constant 0.000000e+00 : f32
    %20 = vector.broadcast %cst_21 : f32 to vector<8x32xf32>
    %21 = vector.extract_strided_slice %8 {offsets = [0, 0], sizes = [8, 8], strides = [1, 1]} : vector<8x32xf32> to vector<8x8xf32>
    %22 = vector.extract_strided_slice %13 {offsets = [0, 0], sizes = [8, 8], strides = [1, 1]} : vector<8x32xf32> to vector<8x8xf32>
    %cst_22 = arith.constant dense<0.000000e+00> : vector<8x8xf32>
    %23 = tpu.matmul %21, %22, %cst_22 {dimension_numbers = #tpu.dot_dimension_numbers<[1], [1], [0], [0], [0, 0, 1, 0], [], []>} : vector<8x8xf32>, vector<8x8xf32>, vector<8x8xf32> -> vector<8x8xf32>
    %cst_23 = arith.constant 0.353553385 : f32
    %24 = vector.broadcast %cst_23 : f32 to vector<8x8xf32>
    %25 = arith.mulf %23, %24 : vector<8x8xf32>
    %cst_24 = arith.constant dense<0xFF800000> : vector<8xf32>
    %26 = vector.multi_reduction <maximumf>, %25, %cst_24 [1] : vector<8x8xf32> to vector<8xf32>
    %27 = vector.shape_cast %26 : vector<8xf32> to vector<8x1xf32>
    %28 = vector.broadcast %27 : vector<8x1xf32> to vector<8x8xf32>
    %29 = arith.subf %25, %28 : vector<8x8xf32>
    %30 = math.exp %29 : vector<8x8xf32>
    %cst_25 = arith.constant dense<0.000000e+00> : vector<8xf32>
    %31 = vector.multi_reduction <add>, %30, %cst_25 [1] : vector<8x8xf32> to vector<8xf32>
    %32 = vector.shape_cast %31 : vector<8xf32> to vector<8x1xf32>
    %33 = tpu.reciprocal %32 {approx = true} : vector<8x1xf32> -> vector<8x1xf32>
    %34 = vector.broadcast %33 : vector<8x1xf32> to vector<8x8xf32>
    %35 = arith.mulf %30, %34 : vector<8x8xf32>
    %36 = vector.extract_strided_slice %18 {offsets = [0, 0], sizes = [8, 8], strides = [1, 1]} : vector<8x32xf32> to vector<8x8xf32>
    %cst_26 = arith.constant dense<0.000000e+00> : vector<8x8xf32>
    %37 = tpu.matmul %35, %36, %cst_26 {dimension_numbers = #tpu.dot_dimension_numbers<[1], [0], [0], [1], [0, 0, 1, 1], [], []>} : vector<8x8xf32>, vector<8x8xf32>, vector<8x8xf32> -> vector<8x8xf32>
    %38 = vector.extract_strided_slice %19 {offsets = [0, 0], sizes = [8, 32], strides = [1, 1]} : vector<32x32xf32> to vector<8x32xf32>
    %cst_27 = arith.constant dense<0.000000e+00> : vector<8x32xf32>
    %39 = tpu.matmul %37, %38, %cst_27 {dimension_numbers = #tpu.dot_dimension_numbers<[1], [0], [0], [1], [0, 0, 1, 1], [], []>} : vector<8x8xf32>, vector<8x32xf32>, vector<8x32xf32> -> vector<8x32xf32>
    %40 = arith.addf %20, %39 : vector<8x32xf32>
    %41 = vector.extract_strided_slice %8 {offsets = [0, 8], sizes = [8, 8], strides = [1, 1]} : vector<8x32xf32> to vector<8x8xf32>
    %42 = vector.extract_strided_slice %13 {offsets = [0, 8], sizes = [8, 8], strides = [1, 1]} : vector<8x32xf32> to vector<8x8xf32>
    %cst_28 = arith.constant dense<0.000000e+00> : vector<8x8xf32>
    %43 = tpu.matmul %41, %42, %cst_28 {dimension_numbers = #tpu.dot_dimension_numbers<[1], [1], [0], [0], [0, 0, 1, 0], [], []>} : vector<8x8xf32>, vector<8x8xf32>, vector<8x8xf32> -> vector<8x8xf32>
    %cst_29 = arith.constant 0.353553385 : f32
    %44 = vector.broadcast %cst_29 : f32 to vector<8x8xf32>
    %45 = arith.mulf %43, %44 : vector<8x8xf32>
    %cst_30 = arith.constant dense<0xFF800000> : vector<8xf32>
    %46 = vector.multi_reduction <maximumf>, %45, %cst_30 [1] : vector<8x8xf32> to vector<8xf32>
    %47 = vector.shape_cast %46 : vector<8xf32> to vector<8x1xf32>
    %48 = vector.broadcast %47 : vector<8x1xf32> to vector<8x8xf32>
    %49 = arith.subf %45, %48 : vector<8x8xf32>
    %50 = math.exp %49 : vector<8x8xf32>
    %cst_31 = arith.constant dense<0.000000e+00> : vector<8xf32>
    %51 = vector.multi_reduction <add>, %50, %cst_31 [1] : vector<8x8xf32> to vector<8xf32>
    %52 = vector.shape_cast %51 : vector<8xf32> to vector<8x1xf32>
    %53 = tpu.reciprocal %52 {approx = true} : vector<8x1xf32> -> vector<8x1xf32>
    %54 = vector.broadcast %53 : vector<8x1xf32> to vector<8x8xf32>
    %55 = arith.mulf %50, %54 : vector<8x8xf32>
    %56 = vector.extract_strided_slice %18 {offsets = [0, 8], sizes = [8, 8], strides = [1, 1]} : vector<8x32xf32> to vector<8x8xf32>
    %cst_32 = arith.constant dense<0.000000e+00> : vector<8x8xf32>
    %57 = tpu.matmul %55, %56, %cst_32 {dimension_numbers = #tpu.dot_dimension_numbers<[1], [0], [0], [1], [0, 0, 1, 1], [], []>} : vector<8x8xf32>, vector<8x8xf32>, vector<8x8xf32> -> vector<8x8xf32>
    %58 = vector.extract_strided_slice %19 {offsets = [8, 0], sizes = [8, 32], strides = [1, 1]} : vector<32x32xf32> to vector<8x32xf32>
    %cst_33 = arith.constant dense<0.000000e+00> : vector<8x32xf32>
    %59 = tpu.matmul %57, %58, %cst_33 {dimension_numbers = #tpu.dot_dimension_numbers<[1], [0], [0], [1], [0, 0, 1, 1], [], []>} : vector<8x8xf32>, vector<8x32xf32>, vector<8x32xf32> -> vector<8x32xf32>
    %60 = arith.addf %40, %59 : vector<8x32xf32>
    %61 = vector.extract_strided_slice %8 {offsets = [0, 16], sizes = [8, 8], strides = [1, 1]} : vector<8x32xf32> to vector<8x8xf32>
    %62 = vector.extract_strided_slice %13 {offsets = [0, 16], sizes = [8, 8], strides = [1, 1]} : vector<8x32xf32> to vector<8x8xf32>
    %cst_34 = arith.constant dense<0.000000e+00> : vector<8x8xf32>
    %63 = tpu.matmul %61, %62, %cst_34 {dimension_numbers = #tpu.dot_dimension_numbers<[1], [1], [0], [0], [0, 0, 1, 0], [], []>} : vector<8x8xf32>, vector<8x8xf32>, vector<8x8xf32> -> vector<8x8xf32>
    %cst_35 = arith.constant 0.353553385 : f32
    %64 = vector.broadcast %cst_35 : f32 to vector<8x8xf32>
    %65 = arith.mulf %63, %64 : vector<8x8xf32>
    %cst_36 = arith.constant dense<0xFF800000> : vector<8xf32>
    %66 = vector.multi_reduction <maximumf>, %65, %cst_36 [1] : vector<8x8xf32> to vector<8xf32>
    %67 = vector.shape_cast %66 : vector<8xf32> to vector<8x1xf32>
    %68 = vector.broadcast %67 : vector<8x1xf32> to vector<8x8xf32>
    %69 = arith.subf %65, %68 : vector<8x8xf32>
    %70 = math.exp %69 : vector<8x8xf32>
    %cst_37 = arith.constant dense<0.000000e+00> : vector<8xf32>
    %71 = vector.multi_reduction <add>, %70, %cst_37 [1] : vector<8x8xf32> to vector<8xf32>
    %72 = vector.shape_cast %71 : vector<8xf32> to vector<8x1xf32>
    %73 = tpu.reciprocal %72 {approx = true} : vector<8x1xf32> -> vector<8x1xf32>
    %74 = vector.broadcast %73 : vector<8x1xf32> to vector<8x8xf32>
    %75 = arith.mulf %70, %74 : vector<8x8xf32>
    %76 = vector.extract_strided_slice %18 {offsets = [0, 16], sizes = [8, 8], strides = [1, 1]} : vector<8x32xf32> to vector<8x8xf32>
    %cst_38 = arith.constant dense<0.000000e+00> : vector<8x8xf32>
    %77 = tpu.matmul %75, %76, %cst_38 {dimension_numbers = #tpu.dot_dimension_numbers<[1], [0], [0], [1], [0, 0, 1, 1], [], []>} : vector<8x8xf32>, vector<8x8xf32>, vector<8x8xf32> -> vector<8x8xf32>
    %78 = vector.extract_strided_slice %19 {offsets = [16, 0], sizes = [8, 32], strides = [1, 1]} : vector<32x32xf32> to vector<8x32xf32>
    %cst_39 = arith.constant dense<0.000000e+00> : vector<8x32xf32>
    %79 = tpu.matmul %77, %78, %cst_39 {dimension_numbers = #tpu.dot_dimension_numbers<[1], [0], [0], [1], [0, 0, 1, 1], [], []>} : vector<8x8xf32>, vector<8x32xf32>, vector<8x32xf32> -> vector<8x32xf32>
    %80 = arith.addf %60, %79 : vector<8x32xf32>
    %81 = vector.extract_strided_slice %8 {offsets = [0, 24], sizes = [8, 8], strides = [1, 1]} : vector<8x32xf32> to vector<8x8xf32>
    %82 = vector.extract_strided_slice %13 {offsets = [0, 24], sizes = [8, 8], strides = [1, 1]} : vector<8x32xf32> to vector<8x8xf32>
    %cst_40 = arith.constant dense<0.000000e+00> : vector<8x8xf32>
    %83 = tpu.matmul %81, %82, %cst_40 {dimension_numbers = #tpu.dot_dimension_numbers<[1], [1], [0], [0], [0, 0, 1, 0], [], []>} : vector<8x8xf32>, vector<8x8xf32>, vector<8x8xf32> -> vector<8x8xf32>
    %cst_41 = arith.constant 0.353553385 : f32
    %84 = vector.broadcast %cst_41 : f32 to vector<8x8xf32>
    %85 = arith.mulf %83, %84 : vector<8x8xf32>
    %cst_42 = arith.constant dense<0xFF800000> : vector<8xf32>
    %86 = vector.multi_reduction <maximumf>, %85, %cst_42 [1] : vector<8x8xf32> to vector<8xf32>
    %87 = vector.shape_cast %86 : vector<8xf32> to vector<8x1xf32>
    %88 = vector.broadcast %87 : vector<8x1xf32> to vector<8x8xf32>
    %89 = arith.subf %85, %88 : vector<8x8xf32>
    %90 = math.exp %89 : vector<8x8xf32>
    %cst_43 = arith.constant dense<0.000000e+00> : vector<8xf32>
    %91 = vector.multi_reduction <add>, %90, %cst_43 [1] : vector<8x8xf32> to vector<8xf32>
    %92 = vector.shape_cast %91 : vector<8xf32> to vector<8x1xf32>
    %93 = tpu.reciprocal %92 {approx = true} : vector<8x1xf32> -> vector<8x1xf32>
    %94 = vector.broadcast %93 : vector<8x1xf32> to vector<8x8xf32>
    %95 = arith.mulf %90, %94 : vector<8x8xf32>
    %96 = vector.extract_strided_slice %18 {offsets = [0, 24], sizes = [8, 8], strides = [1, 1]} : vector<8x32xf32> to vector<8x8xf32>
    %cst_44 = arith.constant dense<0.000000e+00> : vector<8x8xf32>
    %97 = tpu.matmul %95, %96, %cst_44 {dimension_numbers = #tpu.dot_dimension_numbers<[1], [0], [0], [1], [0, 0, 1, 1], [], []>} : vector<8x8xf32>, vector<8x8xf32>, vector<8x8xf32> -> vector<8x8xf32>
    %98 = vector.extract_strided_slice %19 {offsets = [24, 0], sizes = [8, 32], strides = [1, 1]} : vector<32x32xf32> to vector<8x32xf32>
    %cst_45 = arith.constant dense<0.000000e+00> : vector<8x32xf32>
    %99 = tpu.matmul %97, %98, %cst_45 {dimension_numbers = #tpu.dot_dimension_numbers<[1], [0], [0], [1], [0, 0, 1, 1], [], []>} : vector<8x8xf32>, vector<8x32xf32>, vector<8x32xf32> -> vector<8x32xf32>
    %100 = arith.addf %80, %99 : vector<8x32xf32>
    %101 = arith.addf %1, %100 : vector<8x32xf32>
    %c0_46 = arith.constant 0 : index
    %c0_47 = arith.constant 0 : index
    %102 = vector.load %arg10[%c0_46, %c0_47] : memref<1x32xf32, #tpu.memory_space<vmem>>, vector<1x32xf32>
    %103 = vector.broadcast %102 : vector<1x32xf32> to vector<8x32xf32>
    %104 = arith.addf %101, %103 : vector<8x32xf32>
    %cst_48 = arith.constant dense<0.000000e+00> : vector<8xf32>
    %105 = vector.multi_reduction <add>, %104, %cst_48 [1] : vector<8x32xf32> to vector<8xf32>
    %106 = vector.shape_cast %105 : vector<8xf32> to vector<8x1xf32>
    %cst_49 = arith.constant 3.200000e+01 : f32
    %107 = vector.broadcast %cst_49 : f32 to vector<8x1xf32>
    %108 = arith.divf %106, %107 : vector<8x1xf32>
    %109 = vector.broadcast %108 : vector<8x1xf32> to vector<8x32xf32>
    %110 = arith.subf %104, %109 : vector<8x32xf32>
    %111 = arith.mulf %110, %110 : vector<8x32xf32>
    %cst_50 = arith.constant dense<0.000000e+00> : vector<8xf32>
    %112 = vector.multi_reduction <add>, %111, %cst_50 [1] : vector<8x32xf32> to vector<8xf32>
    %113 = vector.shape_cast %112 : vector<8xf32> to vector<8x1xf32>
    %cst_51 = arith.constant 3.200000e+01 : f32
    %114 = vector.broadcast %cst_51 : f32 to vector<8x1xf32>
    %115 = arith.divf %113, %114 : vector<8x1xf32>
    %cst_52 = arith.constant 9.99999974E-6 : f32
    %116 = vector.broadcast %cst_52 : f32 to vector<8x1xf32>
    %117 = arith.addf %115, %116 : vector<8x1xf32>
    %118 = math.rsqrt %117 : vector<8x1xf32>
    %119 = vector.broadcast %118 : vector<8x1xf32> to vector<8x32xf32>
    %120 = arith.mulf %110, %119 : vector<8x32xf32>
    %c0_53 = arith.constant 0 : index
    %c0_54 = arith.constant 0 : index
    %121 = vector.load %arg11[%c0_53, %c0_54] : memref<1x32xf32, #tpu.memory_space<vmem>>, vector<1x32xf32>
    %122 = vector.broadcast %121 : vector<1x32xf32> to vector<8x32xf32>
    %123 = arith.mulf %120, %122 : vector<8x32xf32>
    %c0_55 = arith.constant 0 : index
    %c0_56 = arith.constant 0 : index
    %124 = vector.load %arg12[%c0_55, %c0_56] : memref<1x32xf32, #tpu.memory_space<vmem>>, vector<1x32xf32>
    %125 = vector.broadcast %124 : vector<1x32xf32> to vector<8x32xf32>
    %126 = arith.addf %123, %125 : vector<8x32xf32>
    %c0_57 = arith.constant 0 : index
    %c0_58 = arith.constant 0 : index
    %c0_59 = arith.constant 0 : index
    %127 = vector.load %arg13[%c0_57, %c0_58, %c0_59] : memref<1x8x32xf32, #tpu.memory_space<vmem>>, vector<1x8x32xf32>
    %128 = vector.shape_cast %127 : vector<1x8x32xf32> to vector<8x32xf32>
    %129 = vector.shape_cast %126 : vector<8x32xf32> to vector<1x8x32xf32>
    tpu.vector_store %arg13[%c0_57, %c0_58, %c0_59], %129 {strides = array<i32>} : memref<1x8x32xf32, #tpu.memory_space<vmem>>, vector<1x8x32xf32>,
    return
  }
  func.func @transform_0(%arg0: i32) -> (i32, i32, i32) {
    %c0_i32 = arith.constant 0 : i32
    %c0_i32_0 = arith.constant 0 : i32
    %c0_i32_1 = arith.constant 0 : i32
    return %arg0, %c0_i32, %c0_i32_0 : i32, i32, i32
  }
  func.func @transform_1(%arg0: i32) -> (i32, i32, i32) {
    %c0_i32 = arith.constant 0 : i32
    %c0_i32_0 = arith.constant 0 : i32
    %c0_i32_1 = arith.constant 0 : i32
    return %arg0, %c0_i32, %c0_i32_0 : i32, i32, i32
  }
  func.func @transform_2(%arg0: i32) -> (i32, i32) {
    %c0_i32 = arith.constant 0 : i32
    %c0_i32_0 = arith.constant 0 : i32
    %c0_i32_1 = arith.constant 0 : i32
    return %c0_i32, %c0_i32_0 : i32, i32
  }
  func.func @transform_3(%arg0: i32) -> (i32, i32) {
    %c0_i32 = arith.constant 0 : i32
    %c0_i32_0 = arith.constant 0 : i32
    %c0_i32_1 = arith.constant 0 : i32
    return %c0_i32, %c0_i32_0 : i32, i32
  }
  func.func @transform_4(%arg0: i32) -> (i32, i32) {
    %c0_i32 = arith.constant 0 : i32
    %c0_i32_0 = arith.constant 0 : i32
    %c0_i32_1 = arith.constant 0 : i32
    return %c0_i32, %c0_i32_0 : i32, i32
  }
  func.func @transform_5(%arg0: i32) -> (i32, i32) {
    %c0_i32 = arith.constant 0 : i32
    %c0_i32_0 = arith.constant 0 : i32
    %c0_i32_1 = arith.constant 0 : i32
    return %c0_i32, %c0_i32_0 : i32, i32
  }
  func.func @transform_6(%arg0: i32) -> (i32, i32) {
    %c0_i32 = arith.constant 0 : i32
    %c0_i32_0 = arith.constant 0 : i32
    %c0_i32_1 = arith.constant 0 : i32
    return %c0_i32, %c0_i32_0 : i32, i32
  }
  func.func @transform_7(%arg0: i32) -> (i32, i32) {
    %c0_i32 = arith.constant 0 : i32
    %c0_i32_0 = arith.constant 0 : i32
    %c0_i32_1 = arith.constant 0 : i32
    return %c0_i32, %c0_i32_0 : i32, i32
  }
  func.func @transform_8(%arg0: i32) -> (i32, i32) {
    %c0_i32 = arith.constant 0 : i32
    %c0_i32_0 = arith.constant 0 : i32
    %c0_i32_1 = arith.constant 0 : i32
    return %c0_i32, %c0_i32_0 : i32, i32
  }
  func.func @transform_9(%arg0: i32) -> (i32, i32) {
    %c0_i32 = arith.constant 0 : i32
    %c0_i32_0 = arith.constant 0 : i32
    %c0_i32_1 = arith.constant 0 : i32
    return %c0_i32, %c0_i32_0 : i32, i32
  }
  func.func @transform_10(%arg0: i32) -> (i32, i32) {
    %c0_i32 = arith.constant 0 : i32
    %c0_i32_0 = arith.constant 0 : i32
    %c0_i32_1 = arith.constant 0 : i32
    return %c0_i32, %c0_i32_0 : i32, i32
  }
  func.func @transform_11(%arg0: i32) -> (i32, i32) {
    %c0_i32 = arith.constant 0 : i32
    %c0_i32_0 = arith.constant 0 : i32
    %c0_i32_1 = arith.constant 0 : i32
    return %c0_i32, %c0_i32_0 : i32, i32
  }
  func.func @transform_12(%arg0: i32) -> (i32, i32, i32) {
    %c0_i32 = arith.constant 0 : i32
    %c0_i32_0 = arith.constant 0 : i32
    %c0_i32_1 = arith.constant 0 : i32
    return %arg0, %c0_i32, %c0_i32_0 : i32, i32, i32
  }
}

module attributes {stable_mosaic.version = 11 : i64} {
  func.func @_ffn_ln_kernel(%arg0: i32, %arg1: memref<8x32xf32, #tpu.memory_space<vmem>>, %arg2: memref<32x64xf32, #tpu.memory_space<vmem>>, %arg3: memref<1x64xf32, #tpu.memory_space<vmem>>, %arg4: memref<64x32xf32, #tpu.memory_space<vmem>>, %arg5: memref<1x32xf32, #tpu.memory_space<vmem>>, %arg6: memref<1x32xf32, #tpu.memory_space<vmem>>, %arg7: memref<1x32xf32, #tpu.memory_space<vmem>>, %arg8: memref<8x32xf32, #tpu.memory_space<vmem>>) attributes {dimension_semantics = [#tpu.dimension_semantics<parallel>], iteration_bounds = array<i64: 2>, scalar_prefetch = 0 : i64, scratch_operands = 0 : i64, tpu.core_type = #tpu.core_type<tc>, window_params = [{transform_indices = @transform_0, window_bounds = array<i64: 8, 32>}, {pipeline_mode = #tpu.pipeline_mode<synchronous>, transform_indices = @transform_1, window_bounds = array<i64: 32, 64>}, {pipeline_mode = #tpu.pipeline_mode<synchronous>, transform_indices = @transform_2, window_bounds = array<i64: 1, 64>}, {pipeline_mode = #tpu.pipeline_mode<synchronous>, transform_indices = @transform_3, window_bounds = array<i64: 64, 32>}, {pipeline_mode = #tpu.pipeline_mode<synchronous>, transform_indices = @transform_4, window_bounds = array<i64: 1, 32>}, {pipeline_mode = #tpu.pipeline_mode<synchronous>, transform_indices = @transform_5, window_bounds = array<i64: 1, 32>}, {pipeline_mode = #tpu.pipeline_mode<synchronous>, transform_indices = @transform_6, window_bounds = array<i64: 1, 32>}, {transform_indices = @transform_7, window_bounds = array<i64: 8, 32>}]} {
    %c0 = arith.constant 0 : index
    %c0_0 = arith.constant 0 : index
    %0 = vector.load %arg1[%c0, %c0_0] : memref<8x32xf32, #tpu.memory_space<vmem>>, vector<8x32xf32>
    %c0_1 = arith.constant 0 : index
    %c0_2 = arith.constant 0 : index
    %1 = vector.load %arg2[%c0_1, %c0_2] : memref<32x64xf32, #tpu.memory_space<vmem>>, vector<32x64xf32>
    %cst = arith.constant dense<0.000000e+00> : vector<8x64xf32>
    %2 = tpu.matmul %0, %1, %cst {dimension_numbers = #tpu.dot_dimension_numbers<[1], [0], [0], [1], [0, 0, 1, 1], [], []>} : vector<8x32xf32>, vector<32x64xf32>, vector<8x64xf32> -> vector<8x64xf32>
    %c0_3 = arith.constant 0 : index
    %c0_4 = arith.constant 0 : index
    %3 = vector.load %arg3[%c0_3, %c0_4] : memref<1x64xf32, #tpu.memory_space<vmem>>, vector<1x64xf32>
    %4 = vector.broadcast %3 : vector<1x64xf32> to vector<8x64xf32>
    %5 = arith.addf %2, %4 : vector<8x64xf32>
    %cst_5 = arith.constant 0.000000e+00 : f32
    %6 = vector.broadcast %cst_5 : f32 to vector<8x64xf32>
    %7 = arith.maximumf %5, %6 : vector<8x64xf32>
    %c0_6 = arith.constant 0 : index
    %c0_7 = arith.constant 0 : index
    %8 = vector.load %arg4[%c0_6, %c0_7] : memref<64x32xf32, #tpu.memory_space<vmem>>, vector<64x32xf32>
    %cst_8 = arith.constant dense<0.000000e+00> : vector<8x32xf32>
    %9 = tpu.matmul %7, %8, %cst_8 {dimension_numbers = #tpu.dot_dimension_numbers<[1], [0], [0], [1], [0, 0, 1, 1], [], []>} : vector<8x64xf32>, vector<64x32xf32>, vector<8x32xf32> -> vector<8x32xf32>
    %10 = arith.addf %0, %9 : vector<8x32xf32>
    %c0_9 = arith.constant 0 : index
    %c0_10 = arith.constant 0 : index
    %11 = vector.load %arg5[%c0_9, %c0_10] : memref<1x32xf32, #tpu.memory_space<vmem>>, vector<1x32xf32>
    %12 = vector.broadcast %11 : vector<1x32xf32> to vector<8x32xf32>
    %13 = arith.addf %10, %12 : vector<8x32xf32>
    %cst_11 = arith.constant dense<0.000000e+00> : vector<8xf32>
    %14 = vector.multi_reduction <add>, %13, %cst_11 [1] : vector<8x32xf32> to vector<8xf32>
    %15 = vector.shape_cast %14 : vector<8xf32> to vector<8x1xf32>
    %cst_12 = arith.constant 3.200000e+01 : f32
    %16 = vector.broadcast %cst_12 : f32 to vector<8x1xf32>
    %17 = arith.divf %15, %16 : vector<8x1xf32>
    %18 = vector.broadcast %17 : vector<8x1xf32> to vector<8x32xf32>
    %19 = arith.subf %13, %18 : vector<8x32xf32>
    %20 = arith.mulf %19, %19 : vector<8x32xf32>
    %cst_13 = arith.constant dense<0.000000e+00> : vector<8xf32>
    %21 = vector.multi_reduction <add>, %20, %cst_13 [1] : vector<8x32xf32> to vector<8xf32>
    %22 = vector.shape_cast %21 : vector<8xf32> to vector<8x1xf32>
    %cst_14 = arith.constant 3.200000e+01 : f32
    %23 = vector.broadcast %cst_14 : f32 to vector<8x1xf32>
    %24 = arith.divf %22, %23 : vector<8x1xf32>
    %cst_15 = arith.constant 9.99999974E-6 : f32
    %25 = vector.broadcast %cst_15 : f32 to vector<8x1xf32>
    %26 = arith.addf %24, %25 : vector<8x1xf32>
    %27 = math.rsqrt %26 : vector<8x1xf32>
    %28 = vector.broadcast %27 : vector<8x1xf32> to vector<8x32xf32>
    %29 = arith.mulf %19, %28 : vector<8x32xf32>
    %c0_16 = arith.constant 0 : index
    %c0_17 = arith.constant 0 : index
    %30 = vector.load %arg6[%c0_16, %c0_17] : memref<1x32xf32, #tpu.memory_space<vmem>>, vector<1x32xf32>
    %31 = vector.broadcast %30 : vector<1x32xf32> to vector<8x32xf32>
    %32 = arith.mulf %29, %31 : vector<8x32xf32>
    %c0_18 = arith.constant 0 : index
    %c0_19 = arith.constant 0 : index
    %33 = vector.load %arg7[%c0_18, %c0_19] : memref<1x32xf32, #tpu.memory_space<vmem>>, vector<1x32xf32>
    %34 = vector.broadcast %33 : vector<1x32xf32> to vector<8x32xf32>
    %35 = arith.addf %32, %34 : vector<8x32xf32>
    %c0_20 = arith.constant 0 : index
    %c0_21 = arith.constant 0 : index
    %36 = vector.load %arg8[%c0_20, %c0_21] : memref<8x32xf32, #tpu.memory_space<vmem>>, vector<8x32xf32>
    tpu.vector_store %arg8[%c0_20, %c0_21], %35 {strides = array<i32>} : memref<8x32xf32, #tpu.memory_space<vmem>>, vector<8x32xf32>,
    return
  }
  func.func @transform_0(%arg0: i32) -> (i32, i32) {
    %c0_i32 = arith.constant 0 : i32
    %c0_i32_0 = arith.constant 0 : i32
    return %arg0, %c0_i32 : i32, i32
  }
  func.func @transform_1(%arg0: i32) -> (i32, i32) {
    %c0_i32 = arith.constant 0 : i32
    %c0_i32_0 = arith.constant 0 : i32
    %c0_i32_1 = arith.constant 0 : i32
    return %c0_i32, %c0_i32_0 : i32, i32
  }
  func.func @transform_2(%arg0: i32) -> (i32, i32) {
    %c0_i32 = arith.constant 0 : i32
    %c0_i32_0 = arith.constant 0 : i32
    %c0_i32_1 = arith.constant 0 : i32
    return %c0_i32, %c0_i32_0 : i32, i32
  }
  func.func @transform_3(%arg0: i32) -> (i32, i32) {
    %c0_i32 = arith.constant 0 : i32
    %c0_i32_0 = arith.constant 0 : i32
    %c0_i32_1 = arith.constant 0 : i32
    return %c0_i32, %c0_i32_0 : i32, i32
  }
  func.func @transform_4(%arg0: i32) -> (i32, i32) {
    %c0_i32 = arith.constant 0 : i32
    %c0_i32_0 = arith.constant 0 : i32
    %c0_i32_1 = arith.constant 0 : i32
    return %c0_i32, %c0_i32_0 : i32, i32
  }
  func.func @transform_5(%arg0: i32) -> (i32, i32) {
    %c0_i32 = arith.constant 0 : i32
    %c0_i32_0 = arith.constant 0 : i32
    %c0_i32_1 = arith.constant 0 : i32
    return %c0_i32, %c0_i32_0 : i32, i32
  }
  func.func @transform_6(%arg0: i32) -> (i32, i32) {
    %c0_i32 = arith.constant 0 : i32
    %c0_i32_0 = arith.constant 0 : i32
    %c0_i32_1 = arith.constant 0 : i32
    return %c0_i32, %c0_i32_0 : i32, i32
  }
  func.func @transform_7(%arg0: i32) -> (i32, i32) {
    %c0_i32 = arith.constant 0 : i32
    %c0_i32_0 = arith.constant 0 : i32
    return %arg0, %c0_i32 : i32, i32
  }
}

module attributes {stable_mosaic.version = 11 : i64} {
  func.func @_ln_kernel(%arg0: i32, %arg1: memref<8x32xf32, #tpu.memory_space<vmem>>, %arg2: memref<1x32xf32, #tpu.memory_space<vmem>>, %arg3: memref<1x32xf32, #tpu.memory_space<vmem>>, %arg4: memref<8x32xf32, #tpu.memory_space<vmem>>) attributes {dimension_semantics = [#tpu.dimension_semantics<parallel>], iteration_bounds = array<i64: 2>, scalar_prefetch = 0 : i64, scratch_operands = 0 : i64, tpu.core_type = #tpu.core_type<tc>, window_params = [{transform_indices = @transform_0, window_bounds = array<i64: 8, 32>}, {pipeline_mode = #tpu.pipeline_mode<synchronous>, transform_indices = @transform_1, window_bounds = array<i64: 1, 32>}, {pipeline_mode = #tpu.pipeline_mode<synchronous>, transform_indices = @transform_2, window_bounds = array<i64: 1, 32>}, {transform_indices = @transform_3, window_bounds = array<i64: 8, 32>}]} {
    %c0 = arith.constant 0 : index
    %c0_0 = arith.constant 0 : index
    %0 = vector.load %arg1[%c0, %c0_0] : memref<8x32xf32, #tpu.memory_space<vmem>>, vector<8x32xf32>
    %cst = arith.constant dense<0.000000e+00> : vector<8xf32>
    %1 = vector.multi_reduction <add>, %0, %cst [1] : vector<8x32xf32> to vector<8xf32>
    %2 = vector.shape_cast %1 : vector<8xf32> to vector<8x1xf32>
    %cst_1 = arith.constant 3.200000e+01 : f32
    %3 = vector.broadcast %cst_1 : f32 to vector<8x1xf32>
    %4 = arith.divf %2, %3 : vector<8x1xf32>
    %5 = vector.broadcast %4 : vector<8x1xf32> to vector<8x32xf32>
    %6 = arith.subf %0, %5 : vector<8x32xf32>
    %7 = arith.mulf %6, %6 : vector<8x32xf32>
    %cst_2 = arith.constant dense<0.000000e+00> : vector<8xf32>
    %8 = vector.multi_reduction <add>, %7, %cst_2 [1] : vector<8x32xf32> to vector<8xf32>
    %9 = vector.shape_cast %8 : vector<8xf32> to vector<8x1xf32>
    %cst_3 = arith.constant 3.200000e+01 : f32
    %10 = vector.broadcast %cst_3 : f32 to vector<8x1xf32>
    %11 = arith.divf %9, %10 : vector<8x1xf32>
    %cst_4 = arith.constant 9.99999974E-6 : f32
    %12 = vector.broadcast %cst_4 : f32 to vector<8x1xf32>
    %13 = arith.addf %11, %12 : vector<8x1xf32>
    %14 = math.rsqrt %13 : vector<8x1xf32>
    %15 = vector.broadcast %14 : vector<8x1xf32> to vector<8x32xf32>
    %16 = arith.mulf %6, %15 : vector<8x32xf32>
    %c0_5 = arith.constant 0 : index
    %c0_6 = arith.constant 0 : index
    %17 = vector.load %arg2[%c0_5, %c0_6] : memref<1x32xf32, #tpu.memory_space<vmem>>, vector<1x32xf32>
    %18 = vector.broadcast %17 : vector<1x32xf32> to vector<8x32xf32>
    %19 = arith.mulf %16, %18 : vector<8x32xf32>
    %c0_7 = arith.constant 0 : index
    %c0_8 = arith.constant 0 : index
    %20 = vector.load %arg3[%c0_7, %c0_8] : memref<1x32xf32, #tpu.memory_space<vmem>>, vector<1x32xf32>
    %21 = vector.broadcast %20 : vector<1x32xf32> to vector<8x32xf32>
    %22 = arith.addf %19, %21 : vector<8x32xf32>
    %c0_9 = arith.constant 0 : index
    %c0_10 = arith.constant 0 : index
    %23 = vector.load %arg4[%c0_9, %c0_10] : memref<8x32xf32, #tpu.memory_space<vmem>>, vector<8x32xf32>
    tpu.vector_store %arg4[%c0_9, %c0_10], %22 {strides = array<i32>} : memref<8x32xf32, #tpu.memory_space<vmem>>, vector<8x32xf32>,
    return
  }
  func.func @transform_0(%arg0: i32) -> (i32, i32) {
    %c0_i32 = arith.constant 0 : i32
    %c0_i32_0 = arith.constant 0 : i32
    return %arg0, %c0_i32 : i32, i32
  }
  func.func @transform_1(%arg0: i32) -> (i32, i32) {
    %c0_i32 = arith.constant 0 : i32
    %c0_i32_0 = arith.constant 0 : i32
    %c0_i32_1 = arith.constant 0 : i32
    return %c0_i32, %c0_i32_0 : i32, i32
  }
  func.func @transform_2(%arg0: i32) -> (i32, i32) {
    %c0_i32 = arith.constant 0 : i32
    %c0_i32_0 = arith.constant 0 : i32
    %c0_i32_1 = arith.constant 0 : i32
    return %c0_i32, %c0_i32_0 : i32, i32
  }
  func.func @transform_3(%arg0: i32) -> (i32, i32) {
    %c0_i32 = arith.constant 0 : i32
    %c0_i32_0 = arith.constant 0 : i32
    return %arg0, %c0_i32 : i32, i32
  }
}

module attributes {stable_mosaic.version = 11 : i64} {
  func.func @_mha_ln_kernel(%arg0: i32, %arg1: memref<1x8x32xf32, #tpu.memory_space<vmem>>, %arg2: memref<1x8x32xf32, #tpu.memory_space<vmem>>, %arg3: memref<32x32xf32, #tpu.memory_space<vmem>>, %arg4: memref<32x32xf32, #tpu.memory_space<vmem>>, %arg5: memref<32x32xf32, #tpu.memory_space<vmem>>, %arg6: memref<32x32xf32, #tpu.memory_space<vmem>>, %arg7: memref<1x32xf32, #tpu.memory_space<vmem>>, %arg8: memref<1x32xf32, #tpu.memory_space<vmem>>, %arg9: memref<1x32xf32, #tpu.memory_space<vmem>>, %arg10: memref<1x32xf32, #tpu.memory_space<vmem>>, %arg11: memref<1x32xf32, #tpu.memory_space<vmem>>, %arg12: memref<1x32xf32, #tpu.memory_space<vmem>>, %arg13: memref<8x8xf32, #tpu.memory_space<vmem>>, %arg14: memref<1x8x32xf32, #tpu.memory_space<vmem>>) attributes {dimension_semantics = [#tpu.dimension_semantics<parallel>], iteration_bounds = array<i64: 2>, scalar_prefetch = 0 : i64, scratch_operands = 0 : i64, tpu.core_type = #tpu.core_type<tc>, window_params = [{transform_indices = @transform_0, window_bounds = array<i64: 1, 8, 32>}, {transform_indices = @transform_1, window_bounds = array<i64: 1, 8, 32>}, {pipeline_mode = #tpu.pipeline_mode<synchronous>, transform_indices = @transform_2, window_bounds = array<i64: 32, 32>}, {pipeline_mode = #tpu.pipeline_mode<synchronous>, transform_indices = @transform_3, window_bounds = array<i64: 32, 32>}, {pipeline_mode = #tpu.pipeline_mode<synchronous>, transform_indices = @transform_4, window_bounds = array<i64: 32, 32>}, {pipeline_mode = #tpu.pipeline_mode<synchronous>, transform_indices = @transform_5, window_bounds = array<i64: 32, 32>}, {pipeline_mode = #tpu.pipeline_mode<synchronous>, transform_indices = @transform_6, window_bounds = array<i64: 1, 32>}, {pipeline_mode = #tpu.pipeline_mode<synchronous>, transform_indices = @transform_7, window_bounds = array<i64: 1, 32>}, {pipeline_mode = #tpu.pipeline_mode<synchronous>, transform_indices = @transform_8, window_bounds = array<i64: 1, 32>}, {pipeline_mode = #tpu.pipeline_mode<synchronous>, transform_indices = @transform_9, window_bounds = array<i64: 1, 32>}, {pipeline_mode = #tpu.pipeline_mode<synchronous>, transform_indices = @transform_10, window_bounds = array<i64: 1, 32>}, {pipeline_mode = #tpu.pipeline_mode<synchronous>, transform_indices = @transform_11, window_bounds = array<i64: 1, 32>}, {pipeline_mode = #tpu.pipeline_mode<synchronous>, transform_indices = @transform_12, window_bounds = array<i64: 8, 8>}, {transform_indices = @transform_13, window_bounds = array<i64: 1, 8, 32>}]} {
    %c0 = arith.constant 0 : index
    %c0_0 = arith.constant 0 : index
    %c0_1 = arith.constant 0 : index
    %0 = vector.load %arg1[%c0, %c0_0, %c0_1] : memref<1x8x32xf32, #tpu.memory_space<vmem>>, vector<1x8x32xf32>
    %1 = vector.shape_cast %0 : vector<1x8x32xf32> to vector<8x32xf32>
    %c0_2 = arith.constant 0 : index
    %c0_3 = arith.constant 0 : index
    %c0_4 = arith.constant 0 : index
    %2 = vector.load %arg2[%c0_2, %c0_3, %c0_4] : memref<1x8x32xf32, #tpu.memory_space<vmem>>, vector<1x8x32xf32>
    %3 = vector.shape_cast %2 : vector<1x8x32xf32> to vector<8x32xf32>
    %c0_5 = arith.constant 0 : index
    %c0_6 = arith.constant 0 : index
    %4 = vector.load %arg3[%c0_5, %c0_6] : memref<32x32xf32, #tpu.memory_space<vmem>>, vector<32x32xf32>
    %cst = arith.constant dense<0.000000e+00> : vector<8x32xf32>
    %5 = tpu.matmul %1, %4, %cst {dimension_numbers = #tpu.dot_dimension_numbers<[1], [0], [0], [1], [0, 0, 1, 1], [], []>} : vector<8x32xf32>, vector<32x32xf32>, vector<8x32xf32> -> vector<8x32xf32>
    %c0_7 = arith.constant 0 : index
    %c0_8 = arith.constant 0 : index
    %6 = vector.load %arg7[%c0_7, %c0_8] : memref<1x32xf32, #tpu.memory_space<vmem>>, vector<1x32xf32>
    %7 = vector.broadcast %6 : vector<1x32xf32> to vector<8x32xf32>
    %8 = arith.addf %5, %7 : vector<8x32xf32>
    %c0_9 = arith.constant 0 : index
    %c0_10 = arith.constant 0 : index
    %9 = vector.load %arg4[%c0_9, %c0_10] : memref<32x32xf32, #tpu.memory_space<vmem>>, vector<32x32xf32>
    %cst_11 = arith.constant dense<0.000000e+00> : vector<8x32xf32>
    %10 = tpu.matmul %3, %9, %cst_11 {dimension_numbers = #tpu.dot_dimension_numbers<[1], [0], [0], [1], [0, 0, 1, 1], [], []>} : vector<8x32xf32>, vector<32x32xf32>, vector<8x32xf32> -> vector<8x32xf32>
    %c0_12 = arith.constant 0 : index
    %c0_13 = arith.constant 0 : index
    %11 = vector.load %arg8[%c0_12, %c0_13] : memref<1x32xf32, #tpu.memory_space<vmem>>, vector<1x32xf32>
    %12 = vector.broadcast %11 : vector<1x32xf32> to vector<8x32xf32>
    %13 = arith.addf %10, %12 : vector<8x32xf32>
    %c0_14 = arith.constant 0 : index
    %c0_15 = arith.constant 0 : index
    %14 = vector.load %arg5[%c0_14, %c0_15] : memref<32x32xf32, #tpu.memory_space<vmem>>, vector<32x32xf32>
    %cst_16 = arith.constant dense<0.000000e+00> : vector<8x32xf32>
    %15 = tpu.matmul %3, %14, %cst_16 {dimension_numbers = #tpu.dot_dimension_numbers<[1], [0], [0], [1], [0, 0, 1, 1], [], []>} : vector<8x32xf32>, vector<32x32xf32>, vector<8x32xf32> -> vector<8x32xf32>
    %c0_17 = arith.constant 0 : index
    %c0_18 = arith.constant 0 : index
    %16 = vector.load %arg9[%c0_17, %c0_18] : memref<1x32xf32, #tpu.memory_space<vmem>>, vector<1x32xf32>
    %17 = vector.broadcast %16 : vector<1x32xf32> to vector<8x32xf32>
    %18 = arith.addf %15, %17 : vector<8x32xf32>
    %c0_19 = arith.constant 0 : index
    %c0_20 = arith.constant 0 : index
    %19 = vector.load %arg6[%c0_19, %c0_20] : memref<32x32xf32, #tpu.memory_space<vmem>>, vector<32x32xf32>
    %cst_21 = arith.constant 0.000000e+00 : f32
    %20 = vector.broadcast %cst_21 : f32 to vector<8x32xf32>
    %21 = vector.extract_strided_slice %8 {offsets = [0, 0], sizes = [8, 8], strides = [1, 1]} : vector<8x32xf32> to vector<8x8xf32>
    %22 = vector.extract_strided_slice %13 {offsets = [0, 0], sizes = [8, 8], strides = [1, 1]} : vector<8x32xf32> to vector<8x8xf32>
    %cst_22 = arith.constant dense<0.000000e+00> : vector<8x8xf32>
    %23 = tpu.matmul %21, %22, %cst_22 {dimension_numbers = #tpu.dot_dimension_numbers<[1], [1], [0], [0], [0, 0, 1, 0], [], []>} : vector<8x8xf32>, vector<8x8xf32>, vector<8x8xf32> -> vector<8x8xf32>
    %cst_23 = arith.constant 0.353553385 : f32
    %24 = vector.broadcast %cst_23 : f32 to vector<8x8xf32>
    %25 = arith.mulf %23, %24 : vector<8x8xf32>
    %c0_24 = arith.constant 0 : index
    %c0_25 = arith.constant 0 : index
    %26 = vector.load %arg13[%c0_24, %c0_25] : memref<8x8xf32, #tpu.memory_space<vmem>>, vector<8x8xf32>
    %27 = arith.addf %25, %26 : vector<8x8xf32>
    %cst_26 = arith.constant dense<0xFF800000> : vector<8xf32>
    %28 = vector.multi_reduction <maximumf>, %27, %cst_26 [1] : vector<8x8xf32> to vector<8xf32>
    %29 = vector.shape_cast %28 : vector<8xf32> to vector<8x1xf32>
    %30 = vector.broadcast %29 : vector<8x1xf32> to vector<8x8xf32>
    %31 = arith.subf %27, %30 : vector<8x8xf32>
    %32 = math.exp %31 : vector<8x8xf32>
    %cst_27 = arith.constant dense<0.000000e+00> : vector<8xf32>
    %33 = vector.multi_reduction <add>, %32, %cst_27 [1] : vector<8x8xf32> to vector<8xf32>
    %34 = vector.shape_cast %33 : vector<8xf32> to vector<8x1xf32>
    %35 = tpu.reciprocal %34 {approx = true} : vector<8x1xf32> -> vector<8x1xf32>
    %36 = vector.broadcast %35 : vector<8x1xf32> to vector<8x8xf32>
    %37 = arith.mulf %32, %36 : vector<8x8xf32>
    %38 = vector.extract_strided_slice %18 {offsets = [0, 0], sizes = [8, 8], strides = [1, 1]} : vector<8x32xf32> to vector<8x8xf32>
    %cst_28 = arith.constant dense<0.000000e+00> : vector<8x8xf32>
    %39 = tpu.matmul %37, %38, %cst_28 {dimension_numbers = #tpu.dot_dimension_numbers<[1], [0], [0], [1], [0, 0, 1, 1], [], []>} : vector<8x8xf32>, vector<8x8xf32>, vector<8x8xf32> -> vector<8x8xf32>
    %40 = vector.extract_strided_slice %19 {offsets = [0, 0], sizes = [8, 32], strides = [1, 1]} : vector<32x32xf32> to vector<8x32xf32>
    %cst_29 = arith.constant dense<0.000000e+00> : vector<8x32xf32>
    %41 = tpu.matmul %39, %40, %cst_29 {dimension_numbers = #tpu.dot_dimension_numbers<[1], [0], [0], [1], [0, 0, 1, 1], [], []>} : vector<8x8xf32>, vector<8x32xf32>, vector<8x32xf32> -> vector<8x32xf32>
    %42 = arith.addf %20, %41 : vector<8x32xf32>
    %43 = vector.extract_strided_slice %8 {offsets = [0, 8], sizes = [8, 8], strides = [1, 1]} : vector<8x32xf32> to vector<8x8xf32>
    %44 = vector.extract_strided_slice %13 {offsets = [0, 8], sizes = [8, 8], strides = [1, 1]} : vector<8x32xf32> to vector<8x8xf32>
    %cst_30 = arith.constant dense<0.000000e+00> : vector<8x8xf32>
    %45 = tpu.matmul %43, %44, %cst_30 {dimension_numbers = #tpu.dot_dimension_numbers<[1], [1], [0], [0], [0, 0, 1, 0], [], []>} : vector<8x8xf32>, vector<8x8xf32>, vector<8x8xf32> -> vector<8x8xf32>
    %cst_31 = arith.constant 0.353553385 : f32
    %46 = vector.broadcast %cst_31 : f32 to vector<8x8xf32>
    %47 = arith.mulf %45, %46 : vector<8x8xf32>
    %c0_32 = arith.constant 0 : index
    %c0_33 = arith.constant 0 : index
    %48 = vector.load %arg13[%c0_32, %c0_33] : memref<8x8xf32, #tpu.memory_space<vmem>>, vector<8x8xf32>
    %49 = arith.addf %47, %48 : vector<8x8xf32>
    %cst_34 = arith.constant dense<0xFF800000> : vector<8xf32>
    %50 = vector.multi_reduction <maximumf>, %49, %cst_34 [1] : vector<8x8xf32> to vector<8xf32>
    %51 = vector.shape_cast %50 : vector<8xf32> to vector<8x1xf32>
    %52 = vector.broadcast %51 : vector<8x1xf32> to vector<8x8xf32>
    %53 = arith.subf %49, %52 : vector<8x8xf32>
    %54 = math.exp %53 : vector<8x8xf32>
    %cst_35 = arith.constant dense<0.000000e+00> : vector<8xf32>
    %55 = vector.multi_reduction <add>, %54, %cst_35 [1] : vector<8x8xf32> to vector<8xf32>
    %56 = vector.shape_cast %55 : vector<8xf32> to vector<8x1xf32>
    %57 = tpu.reciprocal %56 {approx = true} : vector<8x1xf32> -> vector<8x1xf32>
    %58 = vector.broadcast %57 : vector<8x1xf32> to vector<8x8xf32>
    %59 = arith.mulf %54, %58 : vector<8x8xf32>
    %60 = vector.extract_strided_slice %18 {offsets = [0, 8], sizes = [8, 8], strides = [1, 1]} : vector<8x32xf32> to vector<8x8xf32>
    %cst_36 = arith.constant dense<0.000000e+00> : vector<8x8xf32>
    %61 = tpu.matmul %59, %60, %cst_36 {dimension_numbers = #tpu.dot_dimension_numbers<[1], [0], [0], [1], [0, 0, 1, 1], [], []>} : vector<8x8xf32>, vector<8x8xf32>, vector<8x8xf32> -> vector<8x8xf32>
    %62 = vector.extract_strided_slice %19 {offsets = [8, 0], sizes = [8, 32], strides = [1, 1]} : vector<32x32xf32> to vector<8x32xf32>
    %cst_37 = arith.constant dense<0.000000e+00> : vector<8x32xf32>
    %63 = tpu.matmul %61, %62, %cst_37 {dimension_numbers = #tpu.dot_dimension_numbers<[1], [0], [0], [1], [0, 0, 1, 1], [], []>} : vector<8x8xf32>, vector<8x32xf32>, vector<8x32xf32> -> vector<8x32xf32>
    %64 = arith.addf %42, %63 : vector<8x32xf32>
    %65 = vector.extract_strided_slice %8 {offsets = [0, 16], sizes = [8, 8], strides = [1, 1]} : vector<8x32xf32> to vector<8x8xf32>
    %66 = vector.extract_strided_slice %13 {offsets = [0, 16], sizes = [8, 8], strides = [1, 1]} : vector<8x32xf32> to vector<8x8xf32>
    %cst_38 = arith.constant dense<0.000000e+00> : vector<8x8xf32>
    %67 = tpu.matmul %65, %66, %cst_38 {dimension_numbers = #tpu.dot_dimension_numbers<[1], [1], [0], [0], [0, 0, 1, 0], [], []>} : vector<8x8xf32>, vector<8x8xf32>, vector<8x8xf32> -> vector<8x8xf32>
    %cst_39 = arith.constant 0.353553385 : f32
    %68 = vector.broadcast %cst_39 : f32 to vector<8x8xf32>
    %69 = arith.mulf %67, %68 : vector<8x8xf32>
    %c0_40 = arith.constant 0 : index
    %c0_41 = arith.constant 0 : index
    %70 = vector.load %arg13[%c0_40, %c0_41] : memref<8x8xf32, #tpu.memory_space<vmem>>, vector<8x8xf32>
    %71 = arith.addf %69, %70 : vector<8x8xf32>
    %cst_42 = arith.constant dense<0xFF800000> : vector<8xf32>
    %72 = vector.multi_reduction <maximumf>, %71, %cst_42 [1] : vector<8x8xf32> to vector<8xf32>
    %73 = vector.shape_cast %72 : vector<8xf32> to vector<8x1xf32>
    %74 = vector.broadcast %73 : vector<8x1xf32> to vector<8x8xf32>
    %75 = arith.subf %71, %74 : vector<8x8xf32>
    %76 = math.exp %75 : vector<8x8xf32>
    %cst_43 = arith.constant dense<0.000000e+00> : vector<8xf32>
    %77 = vector.multi_reduction <add>, %76, %cst_43 [1] : vector<8x8xf32> to vector<8xf32>
    %78 = vector.shape_cast %77 : vector<8xf32> to vector<8x1xf32>
    %79 = tpu.reciprocal %78 {approx = true} : vector<8x1xf32> -> vector<8x1xf32>
    %80 = vector.broadcast %79 : vector<8x1xf32> to vector<8x8xf32>
    %81 = arith.mulf %76, %80 : vector<8x8xf32>
    %82 = vector.extract_strided_slice %18 {offsets = [0, 16], sizes = [8, 8], strides = [1, 1]} : vector<8x32xf32> to vector<8x8xf32>
    %cst_44 = arith.constant dense<0.000000e+00> : vector<8x8xf32>
    %83 = tpu.matmul %81, %82, %cst_44 {dimension_numbers = #tpu.dot_dimension_numbers<[1], [0], [0], [1], [0, 0, 1, 1], [], []>} : vector<8x8xf32>, vector<8x8xf32>, vector<8x8xf32> -> vector<8x8xf32>
    %84 = vector.extract_strided_slice %19 {offsets = [16, 0], sizes = [8, 32], strides = [1, 1]} : vector<32x32xf32> to vector<8x32xf32>
    %cst_45 = arith.constant dense<0.000000e+00> : vector<8x32xf32>
    %85 = tpu.matmul %83, %84, %cst_45 {dimension_numbers = #tpu.dot_dimension_numbers<[1], [0], [0], [1], [0, 0, 1, 1], [], []>} : vector<8x8xf32>, vector<8x32xf32>, vector<8x32xf32> -> vector<8x32xf32>
    %86 = arith.addf %64, %85 : vector<8x32xf32>
    %87 = vector.extract_strided_slice %8 {offsets = [0, 24], sizes = [8, 8], strides = [1, 1]} : vector<8x32xf32> to vector<8x8xf32>
    %88 = vector.extract_strided_slice %13 {offsets = [0, 24], sizes = [8, 8], strides = [1, 1]} : vector<8x32xf32> to vector<8x8xf32>
    %cst_46 = arith.constant dense<0.000000e+00> : vector<8x8xf32>
    %89 = tpu.matmul %87, %88, %cst_46 {dimension_numbers = #tpu.dot_dimension_numbers<[1], [1], [0], [0], [0, 0, 1, 0], [], []>} : vector<8x8xf32>, vector<8x8xf32>, vector<8x8xf32> -> vector<8x8xf32>
    %cst_47 = arith.constant 0.353553385 : f32
    %90 = vector.broadcast %cst_47 : f32 to vector<8x8xf32>
    %91 = arith.mulf %89, %90 : vector<8x8xf32>
    %c0_48 = arith.constant 0 : index
    %c0_49 = arith.constant 0 : index
    %92 = vector.load %arg13[%c0_48, %c0_49] : memref<8x8xf32, #tpu.memory_space<vmem>>, vector<8x8xf32>
    %93 = arith.addf %91, %92 : vector<8x8xf32>
    %cst_50 = arith.constant dense<0xFF800000> : vector<8xf32>
    %94 = vector.multi_reduction <maximumf>, %93, %cst_50 [1] : vector<8x8xf32> to vector<8xf32>
    %95 = vector.shape_cast %94 : vector<8xf32> to vector<8x1xf32>
    %96 = vector.broadcast %95 : vector<8x1xf32> to vector<8x8xf32>
    %97 = arith.subf %93, %96 : vector<8x8xf32>
    %98 = math.exp %97 : vector<8x8xf32>
    %cst_51 = arith.constant dense<0.000000e+00> : vector<8xf32>
    %99 = vector.multi_reduction <add>, %98, %cst_51 [1] : vector<8x8xf32> to vector<8xf32>
    %100 = vector.shape_cast %99 : vector<8xf32> to vector<8x1xf32>
    %101 = tpu.reciprocal %100 {approx = true} : vector<8x1xf32> -> vector<8x1xf32>
    %102 = vector.broadcast %101 : vector<8x1xf32> to vector<8x8xf32>
    %103 = arith.mulf %98, %102 : vector<8x8xf32>
    %104 = vector.extract_strided_slice %18 {offsets = [0, 24], sizes = [8, 8], strides = [1, 1]} : vector<8x32xf32> to vector<8x8xf32>
    %cst_52 = arith.constant dense<0.000000e+00> : vector<8x8xf32>
    %105 = tpu.matmul %103, %104, %cst_52 {dimension_numbers = #tpu.dot_dimension_numbers<[1], [0], [0], [1], [0, 0, 1, 1], [], []>} : vector<8x8xf32>, vector<8x8xf32>, vector<8x8xf32> -> vector<8x8xf32>
    %106 = vector.extract_strided_slice %19 {offsets = [24, 0], sizes = [8, 32], strides = [1, 1]} : vector<32x32xf32> to vector<8x32xf32>
    %cst_53 = arith.constant dense<0.000000e+00> : vector<8x32xf32>
    %107 = tpu.matmul %105, %106, %cst_53 {dimension_numbers = #tpu.dot_dimension_numbers<[1], [0], [0], [1], [0, 0, 1, 1], [], []>} : vector<8x8xf32>, vector<8x32xf32>, vector<8x32xf32> -> vector<8x32xf32>
    %108 = arith.addf %86, %107 : vector<8x32xf32>
    %109 = arith.addf %1, %108 : vector<8x32xf32>
    %c0_54 = arith.constant 0 : index
    %c0_55 = arith.constant 0 : index
    %110 = vector.load %arg10[%c0_54, %c0_55] : memref<1x32xf32, #tpu.memory_space<vmem>>, vector<1x32xf32>
    %111 = vector.broadcast %110 : vector<1x32xf32> to vector<8x32xf32>
    %112 = arith.addf %109, %111 : vector<8x32xf32>
    %cst_56 = arith.constant dense<0.000000e+00> : vector<8xf32>
    %113 = vector.multi_reduction <add>, %112, %cst_56 [1] : vector<8x32xf32> to vector<8xf32>
    %114 = vector.shape_cast %113 : vector<8xf32> to vector<8x1xf32>
    %cst_57 = arith.constant 3.200000e+01 : f32
    %115 = vector.broadcast %cst_57 : f32 to vector<8x1xf32>
    %116 = arith.divf %114, %115 : vector<8x1xf32>
    %117 = vector.broadcast %116 : vector<8x1xf32> to vector<8x32xf32>
    %118 = arith.subf %112, %117 : vector<8x32xf32>
    %119 = arith.mulf %118, %118 : vector<8x32xf32>
    %cst_58 = arith.constant dense<0.000000e+00> : vector<8xf32>
    %120 = vector.multi_reduction <add>, %119, %cst_58 [1] : vector<8x32xf32> to vector<8xf32>
    %121 = vector.shape_cast %120 : vector<8xf32> to vector<8x1xf32>
    %cst_59 = arith.constant 3.200000e+01 : f32
    %122 = vector.broadcast %cst_59 : f32 to vector<8x1xf32>
    %123 = arith.divf %121, %122 : vector<8x1xf32>
    %cst_60 = arith.constant 9.99999974E-6 : f32
    %124 = vector.broadcast %cst_60 : f32 to vector<8x1xf32>
    %125 = arith.addf %123, %124 : vector<8x1xf32>
    %126 = math.rsqrt %125 : vector<8x1xf32>
    %127 = vector.broadcast %126 : vector<8x1xf32> to vector<8x32xf32>
    %128 = arith.mulf %118, %127 : vector<8x32xf32>
    %c0_61 = arith.constant 0 : index
    %c0_62 = arith.constant 0 : index
    %129 = vector.load %arg11[%c0_61, %c0_62] : memref<1x32xf32, #tpu.memory_space<vmem>>, vector<1x32xf32>
    %130 = vector.broadcast %129 : vector<1x32xf32> to vector<8x32xf32>
    %131 = arith.mulf %128, %130 : vector<8x32xf32>
    %c0_63 = arith.constant 0 : index
    %c0_64 = arith.constant 0 : index
    %132 = vector.load %arg12[%c0_63, %c0_64] : memref<1x32xf32, #tpu.memory_space<vmem>>, vector<1x32xf32>
    %133 = vector.broadcast %132 : vector<1x32xf32> to vector<8x32xf32>
    %134 = arith.addf %131, %133 : vector<8x32xf32>
    %c0_65 = arith.constant 0 : index
    %c0_66 = arith.constant 0 : index
    %c0_67 = arith.constant 0 : index
    %135 = vector.load %arg14[%c0_65, %c0_66, %c0_67] : memref<1x8x32xf32, #tpu.memory_space<vmem>>, vector<1x8x32xf32>
    %136 = vector.shape_cast %135 : vector<1x8x32xf32> to vector<8x32xf32>
    %137 = vector.shape_cast %134 : vector<8x32xf32> to vector<1x8x32xf32>
    tpu.vector_store %arg14[%c0_65, %c0_66, %c0_67], %137 {strides = array<i32>} : memref<1x8x32xf32, #tpu.memory_space<vmem>>, vector<1x8x32xf32>,
    return
  }
  func.func @transform_0(%arg0: i32) -> (i32, i32, i32) {
    %c0_i32 = arith.constant 0 : i32
    %c0_i32_0 = arith.constant 0 : i32
    %c0_i32_1 = arith.constant 0 : i32
    return %arg0, %c0_i32, %c0_i32_0 : i32, i32, i32
  }
  func.func @transform_1(%arg0: i32) -> (i32, i32, i32) {
    %c0_i32 = arith.constant 0 : i32
    %c0_i32_0 = arith.constant 0 : i32
    %c0_i32_1 = arith.constant 0 : i32
    return %arg0, %c0_i32, %c0_i32_0 : i32, i32, i32
  }
  func.func @transform_2(%arg0: i32) -> (i32, i32) {
    %c0_i32 = arith.constant 0 : i32
    %c0_i32_0 = arith.constant 0 : i32
    %c0_i32_1 = arith.constant 0 : i32
    return %c0_i32, %c0_i32_0 : i32, i32
  }
  func.func @transform_3(%arg0: i32) -> (i32, i32) {
    %c0_i32 = arith.constant 0 : i32
    %c0_i32_0 = arith.constant 0 : i32
    %c0_i32_1 = arith.constant 0 : i32
    return %c0_i32, %c0_i32_0 : i32, i32
  }
  func.func @transform_4(%arg0: i32) -> (i32, i32) {
    %c0_i32 = arith.constant 0 : i32
    %c0_i32_0 = arith.constant 0 : i32
    %c0_i32_1 = arith.constant 0 : i32
    return %c0_i32, %c0_i32_0 : i32, i32
  }
  func.func @transform_5(%arg0: i32) -> (i32, i32) {
    %c0_i32 = arith.constant 0 : i32
    %c0_i32_0 = arith.constant 0 : i32
    %c0_i32_1 = arith.constant 0 : i32
    return %c0_i32, %c0_i32_0 : i32, i32
  }
  func.func @transform_6(%arg0: i32) -> (i32, i32) {
    %c0_i32 = arith.constant 0 : i32
    %c0_i32_0 = arith.constant 0 : i32
    %c0_i32_1 = arith.constant 0 : i32
    return %c0_i32, %c0_i32_0 : i32, i32
  }
  func.func @transform_7(%arg0: i32) -> (i32, i32) {
    %c0_i32 = arith.constant 0 : i32
    %c0_i32_0 = arith.constant 0 : i32
    %c0_i32_1 = arith.constant 0 : i32
    return %c0_i32, %c0_i32_0 : i32, i32
  }
  func.func @transform_8(%arg0: i32) -> (i32, i32) {
    %c0_i32 = arith.constant 0 : i32
    %c0_i32_0 = arith.constant 0 : i32
    %c0_i32_1 = arith.constant 0 : i32
    return %c0_i32, %c0_i32_0 : i32, i32
  }
  func.func @transform_9(%arg0: i32) -> (i32, i32) {
    %c0_i32 = arith.constant 0 : i32
    %c0_i32_0 = arith.constant 0 : i32
    %c0_i32_1 = arith.constant 0 : i32
    return %c0_i32, %c0_i32_0 : i32, i32
  }
  func.func @transform_10(%arg0: i32) -> (i32, i32) {
    %c0_i32 = arith.constant 0 : i32
    %c0_i32_0 = arith.constant 0 : i32
    %c0_i32_1 = arith.constant 0 : i32
    return %c0_i32, %c0_i32_0 : i32, i32
  }
  func.func @transform_11(%arg0: i32) -> (i32, i32) {
    %c0_i32 = arith.constant 0 : i32
    %c0_i32_0 = arith.constant 0 : i32
    %c0_i32_1 = arith.constant 0 : i32
    return %c0_i32, %c0_i32_0 : i32, i32
  }
  func.func @transform_12(%arg0: i32) -> (i32, i32) {
    %c0_i32 = arith.constant 0 : i32
    %c0_i32_0 = arith.constant 0 : i32
    %c0_i32_1 = arith.constant 0 : i32
    return %c0_i32, %c0_i32_0 : i32, i32
  }
  func.func @transform_13(%arg0: i32) -> (i32, i32, i32) {
    %c0_i32 = arith.constant 0 : i32
    %c0_i32_0 = arith.constant 0 : i32
    %c0_i32_1 = arith.constant 0 : i32
    return %arg0, %c0_i32, %c0_i32_0 : i32, i32, i32
  }
}

module attributes {stable_mosaic.version = 11 : i64} {
  func.func @_ln_linear_kernel(%arg0: i32, %arg1: i32, %arg2: memref<8x32xf32, #tpu.memory_space<vmem>>, %arg3: memref<1x32xf32, #tpu.memory_space<vmem>>, %arg4: memref<1x32xf32, #tpu.memory_space<vmem>>, %arg5: memref<32x128xf32, #tpu.memory_space<vmem>>, %arg6: memref<1x128xf32, #tpu.memory_space<vmem>>, %arg7: memref<8x128xf32, #tpu.memory_space<vmem>>) attributes {dimension_semantics = [#tpu.dimension_semantics<parallel>, #tpu.dimension_semantics<parallel>], iteration_bounds = array<i64: 2, 1>, scalar_prefetch = 0 : i64, scratch_operands = 0 : i64, tpu.core_type = #tpu.core_type<tc>, window_params = [{transform_indices = @transform_0, window_bounds = array<i64: 8, 32>}, {pipeline_mode = #tpu.pipeline_mode<synchronous>, transform_indices = @transform_1, window_bounds = array<i64: 1, 32>}, {pipeline_mode = #tpu.pipeline_mode<synchronous>, transform_indices = @transform_2, window_bounds = array<i64: 1, 32>}, {transform_indices = @transform_3, window_bounds = array<i64: 32, 128>}, {transform_indices = @transform_4, window_bounds = array<i64: 1, 128>}, {transform_indices = @transform_5, window_bounds = array<i64: 8, 128>}]} {
    %c0 = arith.constant 0 : index
    %c0_0 = arith.constant 0 : index
    %0 = vector.load %arg2[%c0, %c0_0] : memref<8x32xf32, #tpu.memory_space<vmem>>, vector<8x32xf32>
    %cst = arith.constant dense<0.000000e+00> : vector<8xf32>
    %1 = vector.multi_reduction <add>, %0, %cst [1] : vector<8x32xf32> to vector<8xf32>
    %2 = vector.shape_cast %1 : vector<8xf32> to vector<8x1xf32>
    %cst_1 = arith.constant 3.200000e+01 : f32
    %3 = vector.broadcast %cst_1 : f32 to vector<8x1xf32>
    %4 = arith.divf %2, %3 : vector<8x1xf32>
    %5 = vector.broadcast %4 : vector<8x1xf32> to vector<8x32xf32>
    %6 = arith.subf %0, %5 : vector<8x32xf32>
    %7 = arith.mulf %6, %6 : vector<8x32xf32>
    %cst_2 = arith.constant dense<0.000000e+00> : vector<8xf32>
    %8 = vector.multi_reduction <add>, %7, %cst_2 [1] : vector<8x32xf32> to vector<8xf32>
    %9 = vector.shape_cast %8 : vector<8xf32> to vector<8x1xf32>
    %cst_3 = arith.constant 3.200000e+01 : f32
    %10 = vector.broadcast %cst_3 : f32 to vector<8x1xf32>
    %11 = arith.divf %9, %10 : vector<8x1xf32>
    %cst_4 = arith.constant 9.99999974E-6 : f32
    %12 = vector.broadcast %cst_4 : f32 to vector<8x1xf32>
    %13 = arith.addf %11, %12 : vector<8x1xf32>
    %14 = math.rsqrt %13 : vector<8x1xf32>
    %15 = vector.broadcast %14 : vector<8x1xf32> to vector<8x32xf32>
    %16 = arith.mulf %6, %15 : vector<8x32xf32>
    %c0_5 = arith.constant 0 : index
    %c0_6 = arith.constant 0 : index
    %17 = vector.load %arg3[%c0_5, %c0_6] : memref<1x32xf32, #tpu.memory_space<vmem>>, vector<1x32xf32>
    %18 = vector.broadcast %17 : vector<1x32xf32> to vector<8x32xf32>
    %19 = arith.mulf %16, %18 : vector<8x32xf32>
    %c0_7 = arith.constant 0 : index
    %c0_8 = arith.constant 0 : index
    %20 = vector.load %arg4[%c0_7, %c0_8] : memref<1x32xf32, #tpu.memory_space<vmem>>, vector<1x32xf32>
    %21 = vector.broadcast %20 : vector<1x32xf32> to vector<8x32xf32>
    %22 = arith.addf %19, %21 : vector<8x32xf32>
    %c0_9 = arith.constant 0 : index
    %c0_10 = arith.constant 0 : index
    %23 = vector.load %arg5[%c0_9, %c0_10] : memref<32x128xf32, #tpu.memory_space<vmem>>, vector<32x128xf32>
    %cst_11 = arith.constant dense<0.000000e+00> : vector<8x128xf32>
    %24 = tpu.matmul %22, %23, %cst_11 {dimension_numbers = #tpu.dot_dimension_numbers<[1], [0], [0], [1], [0, 0, 1, 1], [], []>} : vector<8x32xf32>, vector<32x128xf32>, vector<8x128xf32> -> vector<8x128xf32>
    %c0_12 = arith.constant 0 : index
    %c0_13 = arith.constant 0 : index
    %25 = vector.load %arg6[%c0_12, %c0_13] : memref<1x128xf32, #tpu.memory_space<vmem>>, vector<1x128xf32>
    %26 = vector.broadcast %25 : vector<1x128xf32> to vector<8x128xf32>
    %27 = arith.addf %24, %26 : vector<8x128xf32>
    %c0_14 = arith.constant 0 : index
    %c0_15 = arith.constant 0 : index
    %28 = vector.load %arg7[%c0_14, %c0_15] : memref<8x128xf32, #tpu.memory_space<vmem>>, vector<8x128xf32>
    tpu.vector_store %arg7[%c0_14, %c0_15], %27 {strides = array<i32>} : memref<8x128xf32, #tpu.memory_space<vmem>>, vector<8x128xf32>,
    return
  }
  func.func @transform_0(%arg0: i32, %arg1: i32) -> (i32, i32) {
    %c0_i32 = arith.constant 0 : i32
    %c0_i32_0 = arith.constant 0 : i32
    return %arg0, %c0_i32 : i32, i32
  }
  func.func @transform_1(%arg0: i32, %arg1: i32) -> (i32, i32) {
    %c0_i32 = arith.constant 0 : i32
    %c0_i32_0 = arith.constant 0 : i32
    %c0_i32_1 = arith.constant 0 : i32
    return %c0_i32, %c0_i32_0 : i32, i32
  }
  func.func @transform_2(%arg0: i32, %arg1: i32) -> (i32, i32) {
    %c0_i32 = arith.constant 0 : i32
    %c0_i32_0 = arith.constant 0 : i32
    %c0_i32_1 = arith.constant 0 : i32
    return %c0_i32, %c0_i32_0 : i32, i32
  }
  func.func @transform_3(%arg0: i32, %arg1: i32) -> (i32, i32) {
    %c0_i32 = arith.constant 0 : i32
    %c0_i32_0 = arith.constant 0 : i32
    return %c0_i32, %arg1 : i32, i32
  }
  func.func @transform_4(%arg0: i32, %arg1: i32) -> (i32, i32) {
    %c0_i32 = arith.constant 0 : i32
    %c0_i32_0 = arith.constant 0 : i32
    return %c0_i32, %arg1 : i32, i32
  }
  func.func @transform_5(%arg0: i32, %arg1: i32) -> (i32, i32) {
    %c0_i32 = arith.constant 0 : i32
    return %arg0, %arg1 : i32, i32
  }
}

</mosaic_0001>

<bundles_post_ra>
// kernel: transformer_forward.16
= control target key start
LH: loop header
LB: loop body
LE: loop exit
PB: predicated region body
PF: predicated region fallthrough
CT: control target
= control target key end

     0   :  { %s301_s12 = smov 0   ;;  %s327_s0 = inlined_call_operand.vmem [shape: f32[16,32], index: 0, kind: input, shape index: {}]   ;;  %s328_s1 = inlined_call_operand.vmem [shape: f32[1,32], index: 1, kind: input, shape index: {}]   ;;  %s329_s2 = inlined_call_operand.vmem [shape: f32[1,32], index: 2, kind: input, shape index: {}]   ;;  %s330_s3 = inlined_call_operand.vmem [shape: f32[16,32], index: 3, kind: output, shape index: {}]  }
   0x1 LB: > { %s252_s13 = sadd.s32 4294967295, %s279_s12   ;;  %p256_p0 = scmp.ge.s32.totalorder %s279_s12, 1  ;;  %s279_s12 = sphi %s301_s12, %s13_s12  }
   0x2   : > { %p136_p1 = scmp.lt.s32.totalorder %s279_s12, 3 }
   0x4   : > { %p137_p2 = pnand %p256_p0, %p136_p1 }
   0x5   : > { %p158_p3 = scmp.lt.s32.totalorder (!%p137_p2), %s252_s13, 1  ;;  %vm167_vm0 = vcmask (!%p137_p2), 261120   ;;  %v259_v11 = vld [vmem:[%s328_s1] ss:$0 sm:$0xff] (!%p137_p2) }
   0x6   : > { %140 = sbr.rel (%p137_p2) target bundleno = 331 (0x14b), region = 32  ;;  %v260_v13 = vld [vmem:[%s329_s2] ss:$0 sm:$0xff] (!%p137_p2) }
   0xd   : > { %s332_s13 = smov (!%p158_p3, %s252_s13), 1 }
   0xe   : > { %s257_s14 = sshll.u32 %s332_s13, 3 }
   0xf   : > { %s161_s17 = scalar_lea.vmem %s327_s0, %s257_s14  ;;  %s165_s24 = scalar_lea.vmem %s330_s3, %s257_s14 }
  0x10   : > { %v166_v0 = vld [vmem:[%s161_s17] sm:$0xff] }
  0x11   : > { %v168_v1 = vsel %vm167_vm0, %v166_v0, 0.0 }
  0x12   : > { %169 = vadd.xlane.f32.xlu0 %v168_v1 }
  0x9f   : > { %v170_v2 = vpop.xlane.xlu0 %169 }
  0xa0   : > { %v172_v3 = vmul.f32 0.03125, %v170_v2 }
  0xa2   : > { %v173_v4 = vsub.f32 %v166_v0, %v172_v3 }
  0xa4   : > { %v174_v5 = vmul.f32 %v173_v4, %v173_v4 }
  0xa6   : > { %v175_v6 = vsel %vm167_vm0, %v174_v5, 0.0 }
  0xa7   : > { %176 = vadd.xlane.f32.xlu0 %v175_v6 }
 0x134   : > { %v177_v7 = vpop.xlane.xlu0 %176 }
 0x135   : > { %v178_v8 = vmul.f32 0.03125, %v177_v7 }
 0x137   : > { %v179_v9 = vadd.f32 1e-05, %v178_v8 }
 0x139   : > { %271 = vrsqrt.f32 %v179_v9 }
 0x143   : > { %v272_v10 = vpop.eup %271 }
 0x144   : > { %v181_v12 = vmul.f32 %v272_v10, %v173_v4 }
 0x146   : > { %v189_v14 = vmul.f32 %v259_v11, %v181_v12 }
 0x148   : > { %v197_v15 = vadd.f32 %v260_v13, %v189_v14 }
 0x14a   : > { %198 = vst.msk [vmem:[%s165_s24] sm:$0xff] %vm167_vm0, %v197_v15 }
 0x14b PF: > { %s13_s12 = sadd.s32 1, %s279_s12  }
 0x14c   : > { %p10_p4 = scmp.ge.s32.totalorder %s13_s12, 4  }
 0x14e   :  { %12 = sbr.rel (!%p10_p4) target bundleno = 1 (0x1), region = 62 }

// kernel: transformer_forward.13
= control target key start
LH: loop header
LB: loop body
LE: loop exit
PB: predicated region body
PF: predicated region fallthrough
CT: control target
= control target key end

     0   :  { %s677_s24 = smov 0   ;;  %s753_s0 = inlined_call_operand.vmem [shape: f32[16,32], index: 0, kind: input, shape index: {}]   ;;  %s754_s1 = inlined_call_operand.vmem [shape: f32[32,64], index: 1, kind: input, shape index: {}]   ;;  %s755_s2 = inlined_call_operand.vmem [shape: f32[1,64], index: 2, kind: input, shape index: {}]   ;;  %s756_s3 = inlined_call_operand.vmem [shape: f32[64,32], index: 3, kind: input, shape index: {}]   ;;  %s757_s4 = inlined_call_operand.vmem [shape: f32[1,32], index: 4, kind: input, shape index: {}]   ;;  %s758_s5 = inlined_call_operand.vmem [shape: f32[1,32], index: 5, kind: input, shape index: {}]   ;;  %s759_s6 = inlined_call_operand.vmem [shape: f32[1,32], index: 6, kind: input, shape index: {}]   ;;  %s760_s7 = inlined_call_operand.vmem [shape: f32[16,32], index: 7, kind: output, shape index: {}]  }
   0x1 LB: > { %s536_s25 = sadd.s32 4294967295, %s632_s24   ;;  %p540_p0 = scmp.ge.s32.totalorder %s632_s24, 1  ;;  %s632_s24 = sphi %s677_s24, %s17_s24  }
   0x2   : > { %p236_p1 = scmp.lt.s32.totalorder %s632_s24, 3 }
   0x4   : > { %p237_p2 = pnand %p540_p0, %p236_p1 }
   0x5   : > { %v275_v0 = vld [vmem:[%s754_s1] sm:$0xff] (!%p237_p2)  ;;  %v276_v1 = vld [vmem:[%s754_s1 + $0x8] sm:$0xff] (!%p237_p2)  ;;  %v277_v2 = vld [vmem:[%s754_s1 + $0x10] sm:$0xff] (!%p237_p2)  ;;  %v634_v3 = vmov (!%p237_p2), 0.0|0.0   ;;  %vm635_vm0 = vmmov (!%p237_p2), 0   ;;  %v636_v6 = vmov (!%p237_p2), 0.0  }
   0x6   : > { %240 = sbr.rel (%p237_p2) target bundleno = 763 (0x2fb), region = 48  ;;  %595 = vmatprep.subr.bf16.mxu0 (!%p237_p2), %v634_v3  ;;  %v596_v4 = vpack.c.bf16 (!%p237_p2), %v276_v1, %v275_v0  ;;  %v278_v5 = vld [vmem:[%s754_s1 + $0x18] sm:$0xff] (!%p237_p2)  ;;  %573 = vmatprep.mubr.msk.f32.mxu0 (!%p237_p2), %vm635_vm0, %v636_v6  ;;  %p266_p3 = scmp.lt.s32.totalorder (!%p237_p2), %s536_s25, 1  ;;  %v361_v7 = vld [vmem:[%s756_s3] sm:$0xff] (!%p237_p2)  ;;  %v362_v8 = vld [vmem:[%s756_s3 + $0x8] sm:$0xff] (!%p237_p2)  ;;  %vm286_vm1 = vcmask (!%p237_p2), 261120  }
   0x7   : > { %601 = vmatprep.subr.bf16.mxu1 (!%p237_p2), %v634_v3  ;;  %v602_v9 = vpack.c.bf16 (!%p237_p2), %v362_v8, %v361_v7  ;;  %v363_v10 = vld [vmem:[%s756_s3 + $0x10] sm:$0xff] (!%p237_p2)  ;;  %v364_v11 = vld [vmem:[%s756_s3 + $0x18] sm:$0xff] (!%p237_p2)  ;;  %592 = vmatprep.mubr.msk.f32.mxu1 (!%p237_p2), %vm635_vm0, %v636_v6  ;;  %v599_v12 = vpack.c.bf16 (!%p237_p2), %v278_v5, %v277_v2  ;;  %v365_v14 = vld [vmem:[%s756_s3 + $0x20] sm:$0xff] (!%p237_p2)  ;;  %vm369_vm2 = vcmask (!%p237_p2), 523264  }
   0x8   : > { %597 = vmatpush3.bf16.msra.mxu0 (!%p237_p2), %v596_v4  ;;  %v605_v13 = vpack.c.bf16 (!%p237_p2), %v364_v11, %v363_v10  ;;  %v366_v15 = vld [vmem:[%s756_s3 + $0x28] sm:$0xff] (!%p237_p2)  ;;  %v367_v18 = vld [vmem:[%s756_s3 + $0x30] sm:$0xff] (!%p237_p2)  ;;  %v368_v19 = vld [vmem:[%s756_s3 + $0x38] sm:$0xff] (!%p237_p2) }
   0x9   : > { %598 = vmatprep.subr.bf16.mxu0 (!%p237_p2), %v634_v3  ;;  %603 = vmatpush3.bf16.msra.mxu1 (!%p237_p2), %v602_v9  ;;  %v608_v17 = vpack.c.bf16 (!%p237_p2), %v366_v15, %v365_v14  ;;  %v611_v20 = vpack.c.bf16 (!%p237_p2), %v368_v19, %v367_v18  ;;  %v543_v21 = vld [vmem:[%s755_s2] ss:$0 sm:$0xff] (!%p237_p2) }
   0xa   : > { %604 = vmatprep.subr.bf16.mxu1 (!%p237_p2), %v634_v3  ;;  %v546_v27 = vld [vmem:[%s757_s4] ss:$0 sm:$0xff] (!%p237_p2) }
   0xb   : > { %v547_v41 = vld [vmem:[%s758_s5] ss:$0 sm:$0xff] (!%p237_p2) }
   0xc   : > { %600 = vmatpush3.bf16.msra.mxu0 (!%p237_p2), %v599_v12  ;;  %v548_v43 = vld [vmem:[%s759_s6] ss:$0 sm:$0xff] (!%p237_p2) }
   0xd   : > { %s762_s25 = smov (!%p266_p3, %s536_s25), 1  ;;  %606 = vmatpush3.bf16.msra.mxu1 %v605_v13 }
   0xe   : > { %s541_s19 = sshll.u32 %s762_s25, 3  ;;  %607 = vmatprep.subr.bf16.mxu1 %v634_v3 }
   0xf   : > { %s269_s28 = scalar_lea.vmem %s753_s0, %s541_s19  ;;  %s273_s21 = scalar_lea.vmem %s760_s7, %s541_s19 }
  0x10   : > { %v274_v16 = vld [vmem:[%s269_s28] sm:$0xff] }
  0x11   : > { %574 = vmatmul.mubr.msk.f32.vlgmr.msra.gmra.mrb[0].mxu0 %vm286_vm1, %v274_v16  ;;  %609 = vmatpush3.bf16.msra.mxu1 %v608_v17 }
  0x12   : > { %610 = vmatprep.subr.bf16.mxu1 %v634_v3 }
  0x15   : > { %612 = vmatpush3.bf16.msra.mxu1 %v611_v20 }
  0xe4   : > { %v356_v22 = vpop.f32.mrb[0].mxu0 }
  0xe5   : > { %v357_v23 = vadd.f32 %v543_v21, %v356_v22  ;;  %v575_v24 = vpop.f32.mrb[1].mxu0 }
  0xe7   : > { %v360_v25 = vmax.f32 %v357_v23, 0.0 }
  0xe9   : > { %593 = vmatmul.mubr.msk.f32.vlgmr.msra.gmra.mrb[0].mxu1 %vm369_vm2, %v360_v25 }
 0x1bc   : > { %v439_v26 = vpop.f32.mrb[0].mxu1 }
 0x1bd   : > { %v443_v28 = vadd.f32 %v439_v26, %v274_v16  ;;  %v594_v29 = vpop.f32.mrb[1].mxu1 }
 0x1bf   : > { %v451_v30 = vadd.f32 %v546_v27, %v443_v28 }
 0x1c1   : > { %v452_v31 = vsel %vm286_vm1, %v451_v30, 0.0 }
 0x1c2   : > { %453 = vadd.xlane.f32.xlu0 %v452_v31 }
 0x24f   : > { %v454_v32 = vpop.xlane.xlu0 %453 }
 0x250   : > { %v456_v33 = vmul.f32 0.03125, %v454_v32 }
 0x252   : > { %v457_v34 = vsub.f32 %v451_v30, %v456_v33 }
 0x254   : > { %v458_v35 = vmul.f32 %v457_v34, %v457_v34 }
 0x256   : > { %v459_v36 = vsel %vm286_vm1, %v458_v35, 0.0 }
 0x257   : > { %460 = vadd.xlane.f32.xlu0 %v459_v36 }
 0x2e4   : > { %v461_v37 = vpop.xlane.xlu0 %460 }
 0x2e5   : > { %v462_v38 = vmul.f32 0.03125, %v461_v37 }
 0x2e7   : > { %v463_v39 = vadd.f32 1e-05, %v462_v38 }
 0x2e9   : > { %624 = vrsqrt.f32 %v463_v39 }
 0x2f3   : > { %v625_v40 = vpop.eup %624 }
 0x2f4   : > { %v465_v42 = vmul.f32 %v625_v40, %v457_v34 }
 0x2f6   : > { %v473_v44 = vmul.f32 %v547_v41, %v465_v42 }
 0x2f8   : > { %v481_v45 = vadd.f32 %v548_v43, %v473_v44 }
 0x2fa   : > { %482 = vst.msk [vmem:[%s273_s21] sm:$0xff] %vm286_vm1, %v481_v45 }
 0x2fb PF: > { %s17_s24 = sadd.s32 1, %s632_s24  }
 0x2fc   : > { %p14_p4 = scmp.ge.s32.totalorder %s17_s24, 4  }
 0x2fe   :  { %16 = sbr.rel (!%p14_p4) target bundleno = 1 (0x1), region = 78 }

// kernel: transformer_forward.12
= control target key start
LH: loop header
LB: loop body
LE: loop exit
PB: predicated region body
PF: predicated region fallthrough
CT: control target
= control target key end

     0   :  { %s2038_s21 = smov 0   ;;  %s2223_s0 = inlined_call_operand.vmem [shape: f32[2,8,32], index: 0, kind: input, shape index: {}, may-alias: {0,1}]   ;;  %s2224_s1 = inlined_call_operand.vmem [shape: f32[2,8,32], index: 1, kind: input, shape index: {}, may-alias: {0,1}]   ;;  %s2225_s2 = inlined_call_operand.vmem [shape: f32[32,32], index: 2, kind: input, shape index: {}]   ;;  %s2226_s3 = inlined_call_operand.vmem [shape: f32[32,32], index: 3, kind: input, shape index: {}]   ;;  %s2227_s4 = inlined_call_operand.vmem [shape: f32[32,32], index: 4, kind: input, shape index: {}]   ;;  %s2228_s5 = inlined_call_operand.vmem [shape: f32[32,32], index: 5, kind: input, shape index: {}]   ;;  %s2229_s6 = inlined_call_operand.vmem [shape: f32[1,32], index: 6, kind: input, shape index: {}]   ;;  %s2230_s7 = inlined_call_operand.vmem [shape: f32[1,32], index: 7, kind: input, shape index: {}]   ;;  %s2231_s8 = inlined_call_operand.vmem [shape: f32[1,32], index: 8, kind: input, shape index: {}]   ;;  %s2232_s9 = inlined_call_operand.vmem [shape: f32[1,32], index: 9, kind: input, shape index: {}]   ;;  %s2233_s10 = inlined_call_operand.vmem [shape: f32[1,32], index: 10, kind: input, shape index: {}]   ;;  %s2234_s11 = inlined_call_operand.vmem [shape: f32[1,32], index: 11, kind: input, shape index: {}]   ;;  %s2235_s12 = inlined_call_operand.vmem [shape: f32[2,8,32], index: 12, kind: output, shape index: {}]  }
   0x1 LB: > { %s1742_s22 = sadd.s32 4294967295, %s1965_s21   ;;  %p1746_p0 = scmp.ge.s32.totalorder %s1965_s21, 1  ;;  %s1965_s21 = sphi %s2038_s21, %s22_s21  }
   0x2   : > { %p370_p1 = scmp.lt.s32.totalorder %s1965_s21, 3 }
   0x4   : > { %p371_p2 = pnand %p1746_p0, %p370_p1 }
   0x5   : > { %v513_v0 = vld [vmem:[%s2226_s3] sm:$0xff] (!%p371_p2)  ;;  %v514_v1 = vld [vmem:[%s2226_s3 + $0x8] sm:$0xff] (!%p371_p2)  ;;  %v1967_v3 = vmov (!%p371_p2), 0.0|0.0   ;;  %v515_v6 = vld [vmem:[%s2226_s3 + $0x10] sm:$0xff] (!%p371_p2)  ;;  %p414_p3 = scmp.lt.s32.totalorder (!%p371_p2), %s1742_s22, 1  ;;  %vm1968_vm0 = vmmov (!%p371_p2), 0  }
   0x6   : > { %374 = sbr.rel (%p371_p2) target bundleno = 2898 (0xb52), region = 68  ;;  %v428_v2 = vld [vmem:[%s2225_s2] sm:$0xff] (!%p371_p2)  ;;  %1915 = vmatprep.subr.bf16.mxu1 (!%p371_p2), %v1967_v3  ;;  %v1916_v4 = vpack.c.bf16 (!%p371_p2), %v514_v1, %v513_v0  ;;  %1909 = vmatprep.subr.bf16.mxu0 (!%p371_p2), %v1967_v3  ;;  %v429_v5 = vld [vmem:[%s2225_s2 + $0x8] sm:$0xff] (!%p371_p2)  ;;  %v516_v7 = vld [vmem:[%s2226_s3 + $0x18] sm:$0xff] (!%p371_p2)  ;;  %v1969_v9 = vmov (!%p371_p2), 0.0   ;;  %vm439_vm1 = vcmask (!%p371_p2), 261120  }
   0x7   : > { %v1910_v8 = vpack.c.bf16 (!%p371_p2), %v429_v5, %v428_v2  ;;  %1835 = vmatprep.mubr.msk.f32.mxu1 (!%p371_p2), %vm1968_vm0, %v1969_v9  ;;  %v430_v10 = vld [vmem:[%s2225_s2 + $0x10] sm:$0xff] (!%p371_p2)  ;;  %v431_v11 = vld [vmem:[%s2225_s2 + $0x18] sm:$0xff] (!%p371_p2)  ;;  %1824 = vmatprep.mubr.msk.f32.mxu0 (!%p371_p2), %vm1968_vm0, %v1969_v9  ;;  %v1919_v12 = vpack.c.bf16 (!%p371_p2), %v516_v7, %v515_v6  ;;  %v597_v16 = vld [vmem:[%s2227_s4] sm:$0xff] (!%p371_p2)  ;;  %vm682_vm2 = vcmask (!%p371_p2), 64512  }
   0x8   : > { %1917 = vmatpush3.bf16.msra.mxu1 (!%p371_p2), %v1916_v4  ;;  %v1913_v13 = vpack.c.bf16 (!%p371_p2), %v431_v11, %v430_v10  ;;  %v598_v17 = vld [vmem:[%s2227_s4 + $0x8] sm:$0xff] (!%p371_p2)  ;;  %v599_v18 = vld [vmem:[%s2227_s4 + $0x10] sm:$0xff] (!%p371_p2)  ;;  %v600_v20 = vld [vmem:[%s2227_s4 + $0x18] sm:$0xff] (!%p371_p2) }
   0x9   : > { %1911 = vmatpush3.bf16.msra.mxu0 (!%p371_p2), %v1910_v8  ;;  %1918 = vmatprep.subr.bf16.mxu1 (!%p371_p2), %v1967_v3  ;;  %v1922_v19 = vpack.c.bf16 (!%p371_p2), %v598_v17, %v597_v16  ;;  %v1925_v21 = vpack.c.bf16 (!%p371_p2), %v600_v20, %v599_v18  ;;  %v1752_v22 = vld [vmem:[%s2230_s7] ss:$0 sm:$0xff] (!%p371_p2)  ;;  %v679_v57 = vld [vmem:[%s2228_s5 + $0x8] sm:$0xff] (!%p371_p2) }
   0xa   : > { %1912 = vmatprep.subr.bf16.mxu0 (!%p371_p2), %v1967_v3  ;;  %v1750_v23 = vld [vmem:[%s2229_s6] ss:$0 sm:$0xff] (!%p371_p2) }
   0xb   : > { %v1754_v30 = vld [vmem:[%s2231_s8] ss:$0 sm:$0xff] (!%p371_p2) }
   0xc   : > { %1920 = vmatpush3.bf16.msra.mxu1 (!%p371_p2), %v1919_v12  ;;  %v678_v62 = vld [vmem:[%s2228_s5] sm:$0xff] (!%p371_p2) }
   0xd   : > { %s2237_s22 = smov (!%p414_p3, %s1742_s22), 1  ;;  %1914 = vmatpush3.bf16.msra.mxu0 %v1913_v13  ;;  %1849 = vmatprep.subr.mxu1 %v1969_v9 }
   0xe   : > { %s2074_s23 = sshll.u32 %s2237_s22, 3  ;;  %1921 = vmatprep.subr.bf16.mxu0 %v1967_v3  ;;  %s1972_s22 = smov 104  }
   0xf   : > { %s421_s26 = scalar_lea.vmem %s2224_s1, %s2074_s23  ;;  %s417_s29 = scalar_lea.vmem %s2223_s0, %s2074_s23 }
  0x10   : > { %v427_v14 = vld [vmem:[%s421_s26] sm:$0xff]  ;;  %s1970_s26 = smov 120   ;;  %s425_s30 = scalar_lea.vmem %s2235_s12, %s2074_s23 }
  0x11   : > { %v2084_v15 = vld [vmem:[%s417_s29] sm:$0xff]  ;;  %1836 = vmatmul.mubr.msk.f32.vlgmr.msra.gmra.mrb[0].mxu1 %vm439_vm1, %v427_v14  ;;  %s1971_s29 = smov 112  }
  0x12   : > { %1825 = vmatmul.mubr.msk.f32.vlgmr.msra.gmra.mrb[0].mxu0 %vm439_vm1, %v2084_v15  ;;  %1851 = vmatprep.mubr.msk.f32.mxu1 %vm1968_vm0, %v1969_v9 }
  0x13   : > { %1846 = vmatprep.mubr.msk.f32.mxu0 %vm1968_vm0, %v1969_v9  ;;  %1923 = vmatpush3.bf16.msra.mxu0 %v1922_v19 }
  0x14   : > { %1924 = vmatprep.subr.bf16.mxu0 %v1967_v3 }
  0x17   : > { %1926 = vmatpush3.bf16.msra.mxu0 %v1925_v21 }
  0x18   : > { %1859 = vmatprep.subr.mxu0 %v1969_v9 }
  0x1a   : > { %1847 = vmatmul.mubr.msk.f32.vlgmr.msra.gmra.mrb[2].mxu0 %vm439_vm1, %v427_v14 }
  0x1b   : > { %1861 = vmatprep.mubr.msk.f32.mxu0 %vm1968_vm0, %v1969_v9 }
  0xe4   : > { %v593_v24 = vpop.f32.mrb[0].mxu1 }
  0xe5   : > { %v594_v25 = vadd.f32 %v1752_v22, %v593_v24  ;;  %v1837_v26 = vpop.f32.mrb[1].mxu1  ;;  %v509_v27 = vpop.f32.mrb[0].mxu0 }
  0xe6   : > { %v2116_v28 = vadd.f32 %v1750_v23, %v509_v27  ;;  %v1826_v29 = vpop.f32.mrb[1].mxu0  ;;  %v680_v27 = vld [vmem:[%s2228_s5 + $0x10] sm:$0xff] }
  0xe7   : > { %846 = vrot.lane.b32.xlu0 %v594_v25, %s1970_s26  ;;  %1850 = vmatpush3.xpose.msk.msra.mxu1 %vm682_vm2, %v594_v25 }
  0xe8   : > { %1854 = vmatprep.subr.mxu1 %v1969_v9 }
  0xea   : > { %1852 = vmatmul.mubr.msk.f32.vlgmr.msra.gmra.mrb[2].mxu1 %vm682_vm2, %v2116_v28 }
  0xeb   : > { %844 = vrot.lane.b32.xlu0 %v2116_v28, %s1970_s26  ;;  %1856 = vmatprep.mubr.msk.f32.mxu1 %vm1968_vm0, %v1969_v9 }
  0xed   : > { %v674_v31 = vpop.f32.mrb[2].mxu0 }
  0xee   : > { %v2130_v32 = vadd.f32 %v1754_v30, %v674_v31  ;;  %v1848_v33 = vpop.f32.mrb[3].mxu0 }
  0xf0   : > { %1855 = vmatpush3.msra.mxu1 %v2130_v32 }
  0xf1   : > { %1864 = vmatprep.subr.mxu1 %v1969_v9 }
 0x159   : > { %v847_v34 = vpop.permute.xlu0 %846 }
 0x15a   : > { %1860 = vmatpush3.xpose.msk.msra.mxu0 %vm682_vm2, %v847_v34 }
 0x15b   : > { %1869 = vmatprep.subr.mxu0 %v1969_v9 }
 0x15d   : > { %v845_v35 = vpop.permute.xlu0 %844 }
 0x15e   : > { %1862 = vmatmul.mubr.msk.f32.vlgmr.msra.gmra.mrb[4].mxu0 %vm682_vm2, %v845_v35 }
 0x15f   : > { %1871 = vmatprep.mubr.msk.f32.mxu0 %vm1968_vm0, %v1969_v9  ;;  %1870 = vmatpush3.msra.mxu0 %v679_v57 }
 0x160   : > { %1879 = vmatprep.subr.mxu0 %v1969_v9 }
 0x1bd   : > { %v755_v36 = vpop.f32.mrb[2].mxu1 }
 0x1be   : > { %v759_v37 = vmul.f32 0.35355338, %v755_v36  ;;  %v1853_v38 = vpop.f32.mrb[3].mxu1 }
 0x1c0   : > { %v760_v39 = vsel %vm682_vm2, %v759_v37, -inf }
 0x1c1   : > { %761 = vmax.xlane.f32.xlu1 %v760_v39 }
 0x231   : > { %v918_v40 = vpop.f32.mrb[4].mxu0 }
 0x232   : > { %v922_v41 = vmul.f32 0.35355338, %v918_v40  ;;  %v1863_v42 = vpop.f32.mrb[5].mxu0 }
 0x234   : > { %v923_v43 = vsel %vm682_vm2, %v922_v41, -inf }
 0x235   : > { %924 = vmax.xlane.f32.xlu1 %v923_v43 }
 0x24e   : > { %v762_v44 = vpop.xlane.xlu1 %761 }
 0x24f   : > { %v763_v45 = vsub.f32 %v759_v37, %v762_v44 }
 0x251   : > { %v764_v46 = vmul.f32 1.442695, %v763_v45 }
 0x253   : > { %1941 = vpow2.f32 %v764_v46 }
 0x25d   : > { %v1942_v47 = vpop.eup %1941 }
 0x25e   : > { %v766_v48 = vsel %vm682_vm2, %v1942_v47, 0.0 }
 0x25f   : > { %767 = vadd.xlane.f32.xlu0 %v766_v48 }
 0x275   : > { %1247 = vrot.lane.b32.xlu0 %v2130_v32, %s1971_s29 }
 0x279   : > { %1399 = vrot.lane.b32.xlu0 %v594_v25, %s1972_s22 }
 0x2c2   : > { %v925_v49 = vpop.xlane.xlu1 %924 }
 0x2c3   : > { %v926_v50 = vsub.f32 %v922_v41, %v925_v49 }
 0x2c5   : > { %v927_v51 = vmul.f32 1.442695, %v926_v50 }
 0x2c7   : > { %1943 = vpow2.f32 %v927_v51  ;;  %v1772_v51 = vld [vmem:[%s2232_s9] ss:$0 sm:$0xff] }
 0x2d1   : > { %v1944_v52 = vpop.eup %1943 }
 0x2d2   : > { %v929_v53 = vsel %vm682_vm2, %v1944_v52, 0.0 }
 0x2d3   : > { %930 = vadd.xlane.f32.xlu1 %v929_v53 }
 0x2e4   : > { %935 = vrot.lane.b32.xlu1 %v2130_v32, %s1970_s26 }
 0x2e8   : > { %1159 = vrot.lane.b32.xlu1 %v594_v25, %s1971_s29 }
 0x2ec   : > { %v768_v54 = vpop.xlane.xlu0 %767  ;;  %1157 = vrot.lane.b32.xlu1 %v2116_v28, %s1971_s29 }
 0x2ed   : > { %1945 = vrcp.f32 %v768_v54 }
 0x2f0   : > { %v1248_v0 = vpop.permute.xlu0 %1247 }
 0x2f4   : > { %v1400_v22 = vpop.permute.xlu0 %1399 }
 0x2f7   : > { %v1946_v55 = vpop.eup %1945 }
 0x2f8   : > { %v770_v56 = vmul.f32 %v1946_v55, %v1942_v47 }
 0x2fa   : > { %1857 = vmatmul.mubr.msk.f32.vlgmr.msra.gmra.mrb[4].mxu1 %vm682_vm2, %v770_v56 }
 0x2fb   : > { %1866 = vmatprep.mubr.msk.f32.mxu1 %vm1968_vm0, %v1969_v9 }
 0x360   : > { %v931_v58 = vpop.xlane.xlu1 %930 }
 0x361   : > { %1947 = vrcp.f32 %v931_v58 }
 0x364   : > { %v936_v59 = vpop.permute.xlu1 %935 }
 0x365   : > { %1865 = vmatpush3.msra.mxu1 %v936_v59 }
 0x366   : > { %1874 = vmatprep.subr.mxu1 %v1969_v9 }
 0x368   : > { %v1160_v2 = vpop.permute.xlu1 %1159 }
 0x36b   : > { %v1948_v60 = vpop.eup %1947 }
 0x36c   : > { %v933_v61 = vmul.f32 %v1948_v60, %v1944_v52  ;;  %v1158_v5 = vpop.permute.xlu1 %1157 }
 0x36e   : > { %1867 = vmatmul.mubr.msk.f32.vlgmr.msra.gmra.mrb[6].mxu1 %vm682_vm2, %v933_v61 }
 0x36f   : > { %1875 = vmatpush3.msra.mxu1 %v678_v62  ;;  %1876 = vmatprep.mubr.msk.f32.mxu1 %vm1968_vm0, %v1969_v9 }
 0x370   : > { %1884 = vmatprep.subr.mxu1 %v1969_v9 }
 0x3cd   : > { %v840_v63 = vpop.f32.mrb[4].mxu1 }
 0x3ce   : > { %v1858_v1 = vpop.f32.mrb[5].mxu1  ;;  %1877 = vmatmul.mubr.msk.f32.vlgmr.msra.gmra.mrb[8].mxu1 %vm682_vm2, %v840_v63 }
 0x3cf   : > { %1885 = vmatpush3.msra.mxu1 %v1248_v0  ;;  %1886 = vmatprep.mubr.msk.f32.mxu1 %vm1968_vm0, %v1969_v9  ;;  %v1774_v1 = vld [vmem:[%s2234_s11] ss:$0 sm:$0xff] }
 0x3d0   : > { %1894 = vmatprep.subr.mxu1 %v1969_v9 }
 0x441   : > { %v1007_v3 = vpop.f32.mrb[6].mxu1 }
 0x442   : > { %v1868_v4 = vpop.f32.mrb[7].mxu1  ;;  %1872 = vmatmul.mubr.msk.f32.vlgmr.msra.gmra.mrb[6].mxu0 %vm682_vm2, %v1007_v3 }
 0x443   : > { %1880 = vmatpush3.xpose.msk.msra.mxu0 %vm682_vm2, %v1160_v2  ;;  %1881 = vmatprep.mubr.msk.f32.mxu0 %vm1968_vm0, %v1969_v9 }
 0x444   : > { %1889 = vmatprep.subr.mxu0 %v1969_v9 }
 0x446   : > { %1882 = vmatmul.mubr.msk.f32.vlgmr.msra.gmra.mrb[8].mxu0 %vm682_vm2, %v1158_v5 }
 0x447   : > { %1891 = vmatprep.mubr.msk.f32.mxu0 %vm1968_vm0, %v1969_v9  ;;  %1890 = vmatpush3.msra.mxu0 %v680_v27 }
 0x448   : > { %1899 = vmatprep.subr.mxu0 %v1969_v9 }
 0x4a1   : > { %v1153_v6 = vpop.f32.mrb[8].mxu1 }
 0x4a2   : > { %v1878_v7 = vpop.f32.mrb[9].mxu1 }
 0x515   : > { %v1080_v8 = vpop.f32.mrb[6].mxu0 }
 0x516   : > { %v1154_v10 = vadd.f32 %v1153_v6, %v1080_v8  ;;  %v1873_v11 = vpop.f32.mrb[7].mxu0 }
 0x519   : > { %v1231_v12 = vpop.f32.mrb[8].mxu0 }
 0x51a   : > { %v1235_v13 = vmul.f32 0.35355338, %v1231_v12  ;;  %v1883_v14 = vpop.f32.mrb[9].mxu0 }
 0x51c   : > { %v1236_v16 = vsel %vm682_vm2, %v1235_v13, -inf }
 0x51d   : > { %1237 = vmax.xlane.f32.xlu1 %v1236_v16 }
 0x5aa   : > { %v1238_v17 = vpop.xlane.xlu1 %1237 }
 0x5ab   : > { %v1239_v18 = vsub.f32 %v1235_v13, %v1238_v17 }
 0x5ad   : > { %v1240_v19 = vmul.f32 1.442695, %v1239_v18 }
 0x5af   : > { %1949 = vpow2.f32 %v1240_v19 }
 0x5b9   : > { %v1950_v20 = vpop.eup %1949 }
 0x5ba   : > { %v1242_v21 = vsel %vm682_vm2, %v1950_v20, 0.0 }
 0x5bb   : > { %1243 = vadd.xlane.f32.xlu0 %v1242_v21 }
 0x5d1   : > { %1397 = vrot.lane.b32.xlu0 %v2116_v28, %s1972_s22 }
 0x648   : > { %v1244_v23 = vpop.xlane.xlu0 %1243 }
 0x649   : > { %1951 = vrcp.f32 %v1244_v23 }
 0x64c   : > { %v1398_v26 = vpop.permute.xlu0 %1397 }
 0x653   : > { %v1952_v24 = vpop.eup %1951 }
 0x654   : > { %v1246_v25 = vmul.f32 %v1952_v24, %v1950_v20 }
 0x656   : > { %1887 = vmatmul.mubr.msk.f32.vlgmr.msra.gmra.mrb[10].mxu1 %vm682_vm2, %v1246_v25 }
 0x657   : > { %1895 = vmatpush3.xpose.msk.msra.mxu1 %vm682_vm2, %v1400_v22  ;;  %1896 = vmatprep.mubr.msk.f32.mxu1 %vm1968_vm0, %v1969_v9 }
 0x658   : > { %1904 = vmatprep.subr.mxu1 %v1969_v9 }
 0x65a   : > { %1897 = vmatmul.mubr.msk.f32.vlgmr.msra.gmra.mrb[12].mxu1 %vm682_vm2, %v1398_v26 }
 0x65b   : > { %1906 = vmatprep.mubr.msk.f32.mxu1 %vm1968_vm0, %v1969_v9 }
 0x729   : > { %v1319_v28 = vpop.f32.mrb[10].mxu1 }
 0x72a   : > { %v1888_v29 = vpop.f32.mrb[11].mxu1  ;;  %1892 = vmatmul.mubr.msk.f32.vlgmr.msra.gmra.mrb[10].mxu0 %vm682_vm2, %v1319_v28 }
 0x72b   : > { %1901 = vmatprep.mubr.msk.f32.mxu0 %vm1968_vm0, %v1969_v9  ;;  %v681_v9 = vld [vmem:[%s2228_s5 + $0x18] sm:$0xff] }
 0x72c   : > { %1905 = vmatpush3.msra.mxu1 %v681_v9 }
 0x72d   : > { %v1471_v30 = vpop.f32.mrb[12].mxu1 }
 0x72e   : > { %v1475_v31 = vmul.f32 0.35355338, %v1471_v30  ;;  %v1898_v33 = vpop.f32.mrb[13].mxu1 }
 0x730   : > { %v1476_v34 = vsel %vm682_vm2, %v1475_v31, -inf }
 0x731   : > { %1477 = vmax.xlane.f32.xlu0 %v1476_v34 }
 0x7be   : > { %v1478_v35 = vpop.xlane.xlu0 %1477 }
 0x7bf   : > { %v1479_v36 = vsub.f32 %v1475_v31, %v1478_v35 }
 0x7c1   : > { %v1480_v37 = vmul.f32 1.442695, %v1479_v36 }
 0x7c3   : > { %1953 = vpow2.f32 %v1480_v37 }
 0x7cd   : > { %v1954_v38 = vpop.eup %1953 }
 0x7ce   : > { %v1482_v39 = vsel %vm682_vm2, %v1954_v38, 0.0 }
 0x7cf   : > { %1483 = vadd.xlane.f32.xlu1 %v1482_v39 }
 0x7e0   : > { %1487 = vrot.lane.b32.xlu1 %v2130_v32, %s1972_s22 }
 0x7fd   : > { %v1392_v40 = vpop.f32.mrb[10].mxu0 }
 0x7fe   : > { %v1396_v41 = vadd.f32 %v1392_v40, %v1154_v10  ;;  %v1893_v42 = vpop.f32.mrb[11].mxu0 }
 0x85c   : > { %v1484_v43 = vpop.xlane.xlu1 %1483 }
 0x85d   : > { %1955 = vrcp.f32 %v1484_v43 }
 0x860   : > { %v1488_v44 = vpop.permute.xlu1 %1487 }
 0x861   : > { %1900 = vmatpush3.msra.mxu0 %v1488_v44 }
 0x867   : > { %v1956_v45 = vpop.eup %1955 }
 0x868   : > { %v1486_v46 = vmul.f32 %v1956_v45, %v1954_v38 }
 0x86a   : > { %1902 = vmatmul.mubr.msk.f32.vlgmr.msra.gmra.mrb[12].mxu0 %vm682_vm2, %v1486_v46 }
 0x93d   : > { %v1559_v47 = vpop.f32.mrb[12].mxu0 }
 0x93e   : > { %v1903_v48 = vpop.f32.mrb[13].mxu0  ;;  %1907 = vmatmul.mubr.msk.f32.vlgmr.msra.gmra.mrb[14].mxu1 %vm682_vm2, %v1559_v47 }
 0xa11   : > { %v1632_v32 = vpop.f32.mrb[14].mxu1 }
 0xa12   : > { %v1636_v49 = vadd.f32 %v1632_v32, %v1396_v41  ;;  %v1908_v50 = vpop.f32.mrb[15].mxu1 }
 0xa14   : > { %v1637_v52 = vadd.f32 %v1636_v49, %v2084_v15  ;;  %v1773_v15 = vld [vmem:[%s2233_s10] ss:$0 sm:$0xff] }
 0xa16   : > { %v1645_v53 = vadd.f32 %v1772_v51, %v1637_v52 }
 0xa18   : > { %v1646_v54 = vsel %vm439_vm1, %v1645_v53, 0.0 }
 0xa19   : > { %1647 = vadd.xlane.f32.xlu1 %v1646_v54 }
 0xaa6   : > { %v1648_v55 = vpop.xlane.xlu1 %1647 }
 0xaa7   : > { %v1650_v56 = vmul.f32 0.03125, %v1648_v55 }
 0xaa9   : > { %v1651_v57 = vsub.f32 %v1645_v53, %v1650_v56 }
 0xaab   : > { %v1652_v58 = vmul.f32 %v1651_v57, %v1651_v57 }
 0xaad   : > { %v1653_v59 = vsel %vm439_vm1, %v1652_v58, 0.0 }
 0xaae   : > { %1654 = vadd.xlane.f32.xlu0 %v1653_v59 }
 0xb3b   : > { %v1655_v60 = vpop.xlane.xlu0 %1654 }
 0xb3c   : > { %v1656_v61 = vmul.f32 0.03125, %v1655_v60 }
 0xb3e   : > { %v1657_v62 = vadd.f32 1e-05, %v1656_v61 }
 0xb40   : > { %1957 = vrsqrt.f32 %v1657_v62 }
 0xb4a   : > { %v1958_v63 = vpop.eup %1957 }
 0xb4b   : > { %v1659_v0 = vmul.f32 %v1958_v63, %v1651_v57 }
 0xb4d   : > { %v1667_v2 = vmul.f32 %v1773_v15, %v1659_v0 }
 0xb4f   : > { %v1675_v3 = vadd.f32 %v1774_v1, %v1667_v2 }
 0xb51   : > { %1676 = vst.msk [vmem:[%s425_s30] sm:$0xff] %vm439_vm1, %v1675_v3 }
 0xb52 PF: > { %s22_s21 = sadd.s32 1, %s1965_s21  }
 0xb53   : > { %p19_p4 = scmp.ge.s32.totalorder %s22_s21, 4  }
 0xb55   :  { %21 = sbr.rel (!%p19_p4) target bundleno = 1 (0x1), region = 101 }

// kernel: transformer_forward.17
= control target key start
LH: loop header
LB: loop body
LE: loop exit
PB: predicated region body
PF: predicated region fallthrough
CT: control target
= control target key end

     0   :  { %s2075_s25 = smov 0   ;;  %s2269_s0 = inlined_call_operand.vmem [shape: f32[2,8,32], index: 0, kind: input, shape index: {}, may-alias: {0,1}]   ;;  %s2270_s1 = inlined_call_operand.vmem [shape: f32[2,8,32], index: 1, kind: input, shape index: {}, may-alias: {0,1}]   ;;  %s2271_s2 = inlined_call_operand.vmem [shape: f32[32,32], index: 2, kind: input, shape index: {}]   ;;  %s2272_s3 = inlined_call_operand.vmem [shape: f32[32,32], index: 3, kind: input, shape index: {}]   ;;  %s2273_s4 = inlined_call_operand.vmem [shape: f32[32,32], index: 4, kind: input, shape index: {}]   ;;  %s2274_s5 = inlined_call_operand.vmem [shape: f32[32,32], index: 5, kind: input, shape index: {}]   ;;  %s2275_s6 = inlined_call_operand.vmem [shape: f32[1,32], index: 6, kind: input, shape index: {}]   ;;  %s2276_s7 = inlined_call_operand.vmem [shape: f32[1,32], index: 7, kind: input, shape index: {}]   ;;  %s2277_s8 = inlined_call_operand.vmem [shape: f32[1,32], index: 8, kind: input, shape index: {}]   ;;  %s2278_s9 = inlined_call_operand.vmem [shape: f32[1,32], index: 9, kind: input, shape index: {}]   ;;  %s2279_s10 = inlined_call_operand.vmem [shape: f32[1,32], index: 10, kind: input, shape index: {}]   ;;  %s2280_s11 = inlined_call_operand.vmem [shape: f32[1,32], index: 11, kind: input, shape index: {}]   ;;  %s2281_s12 = inlined_call_operand.vmem [shape: f32[8,8], index: 12, kind: input, shape index: {}]   ;;  %s2282_s13 = inlined_call_operand.vmem [shape: f32[2,8,32], index: 13, kind: output, shape index: {}]  }
   0x1 LB: > { %s1774_s26 = sadd.s32 4294967295, %s1997_s25   ;;  %p1778_p0 = scmp.ge.s32.totalorder %s1997_s25, 1  ;;  %s1997_s25 = sphi %s2075_s25, %s23_s25  }
   0x2   : > { %p395_p1 = scmp.lt.s32.totalorder %s1997_s25, 3 }
   0x4   : > { %p396_p2 = pnand %p1778_p0, %p395_p1 }
   0x5   : > { %v540_v0 = vld [vmem:[%s2272_s3] sm:$0xff] (!%p396_p2)  ;;  %v541_v1 = vld [vmem:[%s2272_s3 + $0x8] sm:$0xff] (!%p396_p2)  ;;  %v1999_v3 = vmov (!%p396_p2), 0.0|0.0   ;;  %v542_v6 = vld [vmem:[%s2272_s3 + $0x10] sm:$0xff] (!%p396_p2)  ;;  %p441_p3 = scmp.lt.s32.totalorder (!%p396_p2), %s1774_s26, 1  ;;  %vm2000_vm0 = vmmov (!%p396_p2), 0  }
   0x6   : > { %399 = sbr.rel (%p396_p2) target bundleno = 2904 (0xb58), region = 72  ;;  %v455_v2 = vld [vmem:[%s2271_s2] sm:$0xff] (!%p396_p2)  ;;  %1947 = vmatprep.subr.bf16.mxu1 (!%p396_p2), %v1999_v3  ;;  %v1948_v4 = vpack.c.bf16 (!%p396_p2), %v541_v1, %v540_v0  ;;  %1941 = vmatprep.subr.bf16.mxu0 (!%p396_p2), %v1999_v3  ;;  %v456_v5 = vld [vmem:[%s2271_s2 + $0x8] sm:$0xff] (!%p396_p2)  ;;  %v543_v7 = vld [vmem:[%s2272_s3 + $0x18] sm:$0xff] (!%p396_p2)  ;;  %v2001_v9 = vmov (!%p396_p2), 0.0   ;;  %vm466_vm1 = vcmask (!%p396_p2), 261120  }
   0x7   : > { %v1942_v8 = vpack.c.bf16 (!%p396_p2), %v456_v5, %v455_v2  ;;  %1867 = vmatprep.mubr.msk.f32.mxu1 (!%p396_p2), %vm2000_vm0, %v2001_v9  ;;  %v457_v10 = vld [vmem:[%s2271_s2 + $0x10] sm:$0xff] (!%p396_p2)  ;;  %v458_v11 = vld [vmem:[%s2271_s2 + $0x18] sm:$0xff] (!%p396_p2)  ;;  %1856 = vmatprep.mubr.msk.f32.mxu0 (!%p396_p2), %vm2000_vm0, %v2001_v9  ;;  %v1951_v12 = vpack.c.bf16 (!%p396_p2), %v543_v7, %v542_v6  ;;  %v624_v16 = vld [vmem:[%s2273_s4] sm:$0xff] (!%p396_p2)  ;;  %vm709_vm2 = vcmask (!%p396_p2), 64512   ;;  %s2002_s15 = smov (!%p396_p2), 120   ;;  %s2003_s19 = smov (!%p396_p2), 112  }
   0x8   : > { %1949 = vmatpush3.bf16.msra.mxu1 (!%p396_p2), %v1948_v4  ;;  %v1945_v13 = vpack.c.bf16 (!%p396_p2), %v458_v11, %v457_v10  ;;  %v625_v17 = vld [vmem:[%s2273_s4 + $0x8] sm:$0xff] (!%p396_p2)  ;;  %v626_v18 = vld [vmem:[%s2273_s4 + $0x10] sm:$0xff] (!%p396_p2)  ;;  %v627_v20 = vld [vmem:[%s2273_s4 + $0x18] sm:$0xff] (!%p396_p2)  ;;  %s2004_s20 = smov (!%p396_p2), 104  }
   0x9   : > { %1943 = vmatpush3.bf16.msra.mxu0 (!%p396_p2), %v1942_v8  ;;  %1950 = vmatprep.subr.bf16.mxu1 (!%p396_p2), %v1999_v3  ;;  %v1954_v19 = vpack.c.bf16 (!%p396_p2), %v625_v17, %v624_v16  ;;  %v1957_v21 = vpack.c.bf16 (!%p396_p2), %v627_v20, %v626_v18  ;;  %v1784_v22 = vld [vmem:[%s2276_s7] ss:$0 sm:$0xff] (!%p396_p2)  ;;  %v706_v60 = vld [vmem:[%s2274_s5 + $0x8] sm:$0xff] (!%p396_p2) }
   0xa   : > { %1944 = vmatprep.subr.bf16.mxu0 (!%p396_p2), %v1999_v3  ;;  %v1782_v23 = vld [vmem:[%s2275_s6] ss:$0 sm:$0xff] (!%p396_p2) }
   0xb   : > { %v1786_v30 = vld [vmem:[%s2277_s8] ss:$0 sm:$0xff] (!%p396_p2) }
   0xc   : > { %1952 = vmatpush3.bf16.msra.mxu1 (!%p396_p2), %v1951_v12  ;;  %v2179_v37 = vld [vmem:[%s2281_s12] sm:$0xff] (!%p396_p2) }
   0xd   : > { %s2284_s26 = smov (!%p441_p3, %s1774_s26), 1  ;;  %1946 = vmatpush3.bf16.msra.mxu0 %v1945_v13  ;;  %1881 = vmatprep.subr.mxu1 %v2001_v9  ;;  %v705_v1 = vld [vmem:[%s2274_s5] sm:$0xff] }
   0xe   : > { %s2111_s28 = sshll.u32 %s2284_s26, 3  ;;  %1953 = vmatprep.subr.bf16.mxu0 %v1999_v3 }
   0xf   : > { %s448_s14 = scalar_lea.vmem %s2270_s1, %s2111_s28  ;;  %s444_s17 = scalar_lea.vmem %s2269_s0, %s2111_s28 }
  0x10   : > { %v454_v14 = vld [vmem:[%s448_s14] sm:$0xff]  ;;  %s452_s22 = scalar_lea.vmem %s2282_s13, %s2111_s28 }
  0x11   : > { %v2121_v15 = vld [vmem:[%s444_s17] sm:$0xff]  ;;  %1868 = vmatmul.mubr.msk.f32.vlgmr.msra.gmra.mrb[0].mxu1 %vm466_vm1, %v454_v14 }
  0x12   : > { %1857 = vmatmul.mubr.msk.f32.vlgmr.msra.gmra.mrb[0].mxu0 %vm466_vm1, %v2121_v15  ;;  %1883 = vmatprep.mubr.msk.f32.mxu1 %vm2000_vm0, %v2001_v9 }
  0x13   : > { %1878 = vmatprep.mubr.msk.f32.mxu0 %vm2000_vm0, %v2001_v9  ;;  %1955 = vmatpush3.bf16.msra.mxu0 %v1954_v19 }
  0x14   : > { %1956 = vmatprep.subr.bf16.mxu0 %v1999_v3 }
  0x17   : > { %1958 = vmatpush3.bf16.msra.mxu0 %v1957_v21 }
  0x18   : > { %1891 = vmatprep.subr.mxu0 %v2001_v9 }
  0x1a   : > { %1879 = vmatmul.mubr.msk.f32.vlgmr.msra.gmra.mrb[2].mxu0 %vm466_vm1, %v454_v14 }
  0x1b   : > { %1893 = vmatprep.mubr.msk.f32.mxu0 %vm2000_vm0, %v2001_v9 }
  0xe4   : > { %v620_v24 = vpop.f32.mrb[0].mxu1 }
  0xe5   : > { %v621_v25 = vadd.f32 %v1784_v22, %v620_v24  ;;  %v1869_v26 = vpop.f32.mrb[1].mxu1  ;;  %v536_v27 = vpop.f32.mrb[0].mxu0 }
  0xe6   : > { %v2153_v28 = vadd.f32 %v1782_v23, %v536_v27  ;;  %v1858_v29 = vpop.f32.mrb[1].mxu0 }
  0xe7   : > { %875 = vrot.lane.b32.xlu0 %v621_v25, %s2002_s15  ;;  %1882 = vmatpush3.xpose.msk.msra.mxu1 %vm709_vm2, %v621_v25 }
  0xe8   : > { %1886 = vmatprep.subr.mxu1 %v2001_v9 }
  0xea   : > { %1884 = vmatmul.mubr.msk.f32.vlgmr.msra.gmra.mrb[2].mxu1 %vm709_vm2, %v2153_v28 }
  0xeb   : > { %873 = vrot.lane.b32.xlu0 %v2153_v28, %s2002_s15  ;;  %1888 = vmatprep.mubr.msk.f32.mxu1 %vm2000_vm0, %v2001_v9 }
  0xed   : > { %v701_v31 = vpop.f32.mrb[2].mxu0 }
  0xee   : > { %v2167_v32 = vadd.f32 %v1786_v30, %v701_v31  ;;  %v1880_v33 = vpop.f32.mrb[3].mxu0 }
  0xf0   : > { %1887 = vmatpush3.msra.mxu1 %v2167_v32 }
  0xf1   : > { %1896 = vmatprep.subr.mxu1 %v2001_v9 }
 0x159   : > { %v876_v34 = vpop.permute.xlu0 %875 }
 0x15a   : > { %1892 = vmatpush3.xpose.msk.msra.mxu0 %vm709_vm2, %v876_v34 }
 0x15b   : > { %1901 = vmatprep.subr.mxu0 %v2001_v9 }
 0x15d   : > { %v874_v35 = vpop.permute.xlu0 %873 }
 0x15e   : > { %1894 = vmatmul.mubr.msk.f32.vlgmr.msra.gmra.mrb[4].mxu0 %vm709_vm2, %v874_v35 }
 0x15f   : > { %1903 = vmatprep.mubr.msk.f32.mxu0 %vm2000_vm0, %v2001_v9  ;;  %1902 = vmatpush3.msra.mxu0 %v706_v60 }
 0x160   : > { %1911 = vmatprep.subr.mxu0 %v2001_v9 }
 0x1bd   : > { %v782_v36 = vpop.f32.mrb[2].mxu1 }
 0x1be   : > { %v786_v38 = vmul.f32 0.35355338, %v782_v36  ;;  %v1885_v39 = vpop.f32.mrb[3].mxu1 }
 0x1c0   : > { %v788_v40 = vadd.f32 %v2179_v37, %v786_v38 }
 0x1c2   : > { %v789_v41 = vsel %vm709_vm2, %v788_v40, -inf }
 0x1c3   : > { %790 = vmax.xlane.f32.xlu1 %v789_v41 }
 0x231   : > { %v947_v42 = vpop.f32.mrb[4].mxu0 }
 0x232   : > { %v951_v43 = vmul.f32 0.35355338, %v947_v42  ;;  %v1895_v44 = vpop.f32.mrb[5].mxu0 }
 0x234   : > { %v952_v45 = vadd.f32 %v951_v43, %v2179_v37 }
 0x236   : > { %v953_v46 = vsel %vm709_vm2, %v952_v45, -inf }
 0x237   : > { %954 = vmax.xlane.f32.xlu1 %v953_v46 }
 0x250   : > { %v791_v47 = vpop.xlane.xlu1 %790 }
 0x251   : > { %v792_v48 = vsub.f32 %v788_v40, %v791_v47 }
 0x253   : > { %v793_v49 = vmul.f32 1.442695, %v792_v48 }
 0x255   : > { %1973 = vpow2.f32 %v793_v49 }
 0x25f   : > { %v1974_v50 = vpop.eup %1973 }
 0x260   : > { %v795_v51 = vsel %vm709_vm2, %v1974_v50, 0.0 }
 0x261   : > { %796 = vadd.xlane.f32.xlu0 %v795_v51 }
 0x277   : > { %1278 = vrot.lane.b32.xlu0 %v2167_v32, %s2003_s19 }
 0x27b   : > { %1430 = vrot.lane.b32.xlu0 %v621_v25, %s2004_s20 }
 0x2c4   : > { %v955_v52 = vpop.xlane.xlu1 %954 }
 0x2c5   : > { %v956_v53 = vsub.f32 %v952_v45, %v955_v52 }
 0x2c7   : > { %v957_v54 = vmul.f32 1.442695, %v956_v53 }
 0x2c9   : > { %1975 = vpow2.f32 %v957_v54 }
 0x2d3   : > { %v1976_v55 = vpop.eup %1975 }
 0x2d4   : > { %v959_v56 = vsel %vm709_vm2, %v1976_v55, 0.0 }
 0x2d5   : > { %960 = vadd.xlane.f32.xlu1 %v959_v56  ;;  %v1804_v56 = vld [vmem:[%s2278_s9] ss:$0 sm:$0xff] }
 0x2e6   : > { %965 = vrot.lane.b32.xlu1 %v2167_v32, %s2002_s15 }
 0x2ea   : > { %1189 = vrot.lane.b32.xlu1 %v621_v25, %s2003_s19 }
 0x2ee   : > { %v797_v57 = vpop.xlane.xlu0 %796  ;;  %1187 = vrot.lane.b32.xlu1 %v2153_v28, %s2003_s19 }
 0x2ef   : > { %1977 = vrcp.f32 %v797_v57 }
 0x2f2   : > { %v1279_v3 = vpop.permute.xlu0 %1278 }
 0x2f6   : > { %v1431_v26 = vpop.permute.xlu0 %1430 }
 0x2f9   : > { %v1978_v58 = vpop.eup %1977 }
 0x2fa   : > { %v799_v59 = vmul.f32 %v1978_v58, %v1974_v50 }
 0x2fc   : > { %1889 = vmatmul.mubr.msk.f32.vlgmr.msra.gmra.mrb[4].mxu1 %vm709_vm2, %v799_v59 }
 0x2fd   : > { %1898 = vmatprep.mubr.msk.f32.mxu1 %vm2000_vm0, %v2001_v9 }
 0x362   : > { %v961_v61 = vpop.xlane.xlu1 %960 }
 0x363   : > { %1979 = vrcp.f32 %v961_v61 }
 0x366   : > { %v966_v62 = vpop.permute.xlu1 %965 }
 0x367   : > { %1897 = vmatpush3.msra.mxu1 %v966_v62 }
 0x368   : > { %1906 = vmatprep.subr.mxu1 %v2001_v9 }
 0x36a   : > { %v1190_v5 = vpop.permute.xlu1 %1189 }
 0x36d   : > { %v1980_v63 = vpop.eup %1979 }
 0x36e   : > { %v963_v0 = vmul.f32 %v1980_v63, %v1976_v55  ;;  %v1188_v8 = vpop.permute.xlu1 %1187 }
 0x370   : > { %1899 = vmatmul.mubr.msk.f32.vlgmr.msra.gmra.mrb[6].mxu1 %vm709_vm2, %v963_v0 }
 0x371   : > { %1907 = vmatpush3.msra.mxu1 %v705_v1  ;;  %1908 = vmatprep.mubr.msk.f32.mxu1 %vm2000_vm0, %v2001_v9 }
 0x372   : > { %1916 = vmatprep.subr.mxu1 %v2001_v9 }
 0x3cf   : > { %v869_v2 = vpop.f32.mrb[4].mxu1 }
 0x3d0   : > { %v1890_v4 = vpop.f32.mrb[5].mxu1  ;;  %1909 = vmatmul.mubr.msk.f32.vlgmr.msra.gmra.mrb[8].mxu1 %vm709_vm2, %v869_v2 }
 0x3d1   : > { %1917 = vmatpush3.msra.mxu1 %v1279_v3  ;;  %1918 = vmatprep.mubr.msk.f32.mxu1 %vm2000_vm0, %v2001_v9 }
 0x3d2   : > { %1926 = vmatprep.subr.mxu1 %v2001_v9 }
 0x443   : > { %v1037_v6 = vpop.f32.mrb[6].mxu1 }
 0x444   : > { %v1900_v7 = vpop.f32.mrb[7].mxu1  ;;  %1904 = vmatmul.mubr.msk.f32.vlgmr.msra.gmra.mrb[6].mxu0 %vm709_vm2, %v1037_v6  ;;  %v1806_v6 = vld [vmem:[%s2280_s11] ss:$0 sm:$0xff] }
 0x445   : > { %1912 = vmatpush3.xpose.msk.msra.mxu0 %vm709_vm2, %v1190_v5  ;;  %1913 = vmatprep.mubr.msk.f32.mxu0 %vm2000_vm0, %v2001_v9 }
 0x446   : > { %1921 = vmatprep.subr.mxu0 %v2001_v9 }
 0x448   : > { %1914 = vmatmul.mubr.msk.f32.vlgmr.msra.gmra.mrb[8].mxu0 %vm709_vm2, %v1188_v8 }
 0x449   : > { %1923 = vmatprep.mubr.msk.f32.mxu0 %vm2000_vm0, %v2001_v9 }
 0x4a3   : > { %v1183_v10 = vpop.f32.mrb[8].mxu1 }
 0x4a4   : > { %v1910_v11 = vpop.f32.mrb[9].mxu1 }
 0x517   : > { %v1110_v12 = vpop.f32.mrb[6].mxu0 }
 0x518   : > { %v1184_v13 = vadd.f32 %v1183_v10, %v1110_v12  ;;  %v1905_v14 = vpop.f32.mrb[7].mxu0 }
 0x51b   : > { %v1261_v16 = vpop.f32.mrb[8].mxu0 }
 0x51c   : > { %v1265_v17 = vmul.f32 0.35355338, %v1261_v16  ;;  %v1915_v18 = vpop.f32.mrb[9].mxu0 }
 0x51e   : > { %v1266_v19 = vadd.f32 %v1265_v17, %v2179_v37 }
 0x520   : > { %v1267_v20 = vsel %vm709_vm2, %v1266_v19, -inf }
 0x521   : > { %1268 = vmax.xlane.f32.xlu1 %v1267_v20 }
 0x5ae   : > { %v1269_v21 = vpop.xlane.xlu1 %1268 }
 0x5af   : > { %v1270_v22 = vsub.f32 %v1266_v19, %v1269_v21 }
 0x5b1   : > { %v1271_v23 = vmul.f32 1.442695, %v1270_v22 }
 0x5b3   : > { %1981 = vpow2.f32 %v1271_v23 }
 0x5bd   : > { %v1982_v24 = vpop.eup %1981 }
 0x5be   : > { %v1273_v25 = vsel %vm709_vm2, %v1982_v24, 0.0 }
 0x5bf   : > { %1274 = vadd.xlane.f32.xlu0 %v1273_v25 }
 0x5d5   : > { %1428 = vrot.lane.b32.xlu0 %v2153_v28, %s2004_s20  ;;  %v707_v28 = vld [vmem:[%s2274_s5 + $0x10] sm:$0xff] }
 0x5d6   : > { %1922 = vmatpush3.msra.mxu0 %v707_v28 }
 0x5d7   : > { %1931 = vmatprep.subr.mxu0 %v2001_v9 }
 0x64c   : > { %v1275_v27 = vpop.xlane.xlu0 %1274 }
 0x64d   : > { %1983 = vrcp.f32 %v1275_v27 }
 0x650   : > { %v1429_v31 = vpop.permute.xlu0 %1428 }
 0x657   : > { %v1984_v29 = vpop.eup %1983 }
 0x658   : > { %v1277_v30 = vmul.f32 %v1984_v29, %v1982_v24 }
 0x65a   : > { %1919 = vmatmul.mubr.msk.f32.vlgmr.msra.gmra.mrb[10].mxu1 %vm709_vm2, %v1277_v30 }
 0x65b   : > { %1927 = vmatpush3.xpose.msk.msra.mxu1 %vm709_vm2, %v1431_v26  ;;  %1928 = vmatprep.mubr.msk.f32.mxu1 %vm2000_vm0, %v2001_v9 }
 0x65c   : > { %1936 = vmatprep.subr.mxu1 %v2001_v9 }
 0x65e   : > { %1929 = vmatmul.mubr.msk.f32.vlgmr.msra.gmra.mrb[12].mxu1 %vm709_vm2, %v1429_v31 }
 0x65f   : > { %1938 = vmatprep.mubr.msk.f32.mxu1 %vm2000_vm0, %v2001_v9 }
 0x72d   : > { %v1350_v33 = vpop.f32.mrb[10].mxu1 }
 0x72e   : > { %v1920_v34 = vpop.f32.mrb[11].mxu1  ;;  %1924 = vmatmul.mubr.msk.f32.vlgmr.msra.gmra.mrb[10].mxu0 %vm709_vm2, %v1350_v33 }
 0x72f   : > { %1933 = vmatprep.mubr.msk.f32.mxu0 %vm2000_vm0, %v2001_v9  ;;  %v708_v9 = vld [vmem:[%s2274_s5 + $0x18] sm:$0xff] }
 0x730   : > { %1937 = vmatpush3.msra.mxu1 %v708_v9 }
 0x731   : > { %v1502_v35 = vpop.f32.mrb[12].mxu1 }
 0x732   : > { %v1506_v36 = vmul.f32 0.35355338, %v1502_v35  ;;  %v1930_v38 = vpop.f32.mrb[13].mxu1 }
 0x734   : > { %v1507_v39 = vadd.f32 %v1506_v36, %v2179_v37 }
 0x736   : > { %v1508_v40 = vsel %vm709_vm2, %v1507_v39, -inf }
 0x737   : > { %1509 = vmax.xlane.f32.xlu0 %v1508_v40 }
 0x7c4   : > { %v1510_v41 = vpop.xlane.xlu0 %1509 }
 0x7c5   : > { %v1511_v42 = vsub.f32 %v1507_v39, %v1510_v41 }
 0x7c7   : > { %v1512_v43 = vmul.f32 1.442695, %v1511_v42 }
 0x7c9   : > { %1985 = vpow2.f32 %v1512_v43 }
 0x7d3   : > { %v1986_v44 = vpop.eup %1985 }
 0x7d4   : > { %v1514_v45 = vsel %vm709_vm2, %v1986_v44, 0.0 }
 0x7d5   : > { %1515 = vadd.xlane.f32.xlu1 %v1514_v45 }
 0x7e6   : > { %1519 = vrot.lane.b32.xlu1 %v2167_v32, %s2004_s20 }
 0x801   : > { %v1423_v37 = vpop.f32.mrb[10].mxu0 }
 0x802   : > { %v1427_v46 = vadd.f32 %v1423_v37, %v1184_v13  ;;  %v1925_v47 = vpop.f32.mrb[11].mxu0 }
 0x862   : > { %v1516_v48 = vpop.xlane.xlu1 %1515 }
 0x863   : > { %1987 = vrcp.f32 %v1516_v48 }
 0x866   : > { %v1520_v49 = vpop.permute.xlu1 %1519 }
 0x867   : > { %1932 = vmatpush3.msra.mxu0 %v1520_v49 }
 0x86d   : > { %v1988_v50 = vpop.eup %1987 }
 0x86e   : > { %v1518_v51 = vmul.f32 %v1988_v50, %v1986_v44 }
 0x870   : > { %1934 = vmatmul.mubr.msk.f32.vlgmr.msra.gmra.mrb[12].mxu0 %vm709_vm2, %v1518_v51 }
 0x943   : > { %v1591_v52 = vpop.f32.mrb[12].mxu0 }
 0x944   : > { %v1935_v53 = vpop.f32.mrb[13].mxu0  ;;  %1939 = vmatmul.mubr.msk.f32.vlgmr.msra.gmra.mrb[14].mxu1 %vm709_vm2, %v1591_v52 }
 0xa17   : > { %v1664_v32 = vpop.f32.mrb[14].mxu1 }
 0xa18   : > { %v1668_v54 = vadd.f32 %v1664_v32, %v1427_v46  ;;  %v1940_v55 = vpop.f32.mrb[15].mxu1 }
 0xa1a   : > { %v1669_v57 = vadd.f32 %v1668_v54, %v2121_v15  ;;  %v1805_v15 = vld [vmem:[%s2279_s10] ss:$0 sm:$0xff] }
 0xa1c   : > { %v1677_v58 = vadd.f32 %v1804_v56, %v1669_v57 }
 0xa1e   : > { %v1678_v59 = vsel %vm466_vm1, %v1677_v58, 0.0 }
 0xa1f   : > { %1679 = vadd.xlane.f32.xlu1 %v1678_v59 }
 0xaac   : > { %v1680_v60 = vpop.xlane.xlu1 %1679 }
 0xaad   : > { %v1682_v61 = vmul.f32 0.03125, %v1680_v60 }
 0xaaf   : > { %v1683_v62 = vsub.f32 %v1677_v58, %v1682_v61 }
 0xab1   : > { %v1684_v63 = vmul.f32 %v1683_v62, %v1683_v62 }
 0xab3   : > { %v1685_v0 = vsel %vm466_vm1, %v1684_v63, 0.0 }
 0xab4   : > { %1686 = vadd.xlane.f32.xlu0 %v1685_v0 }
 0xb41   : > { %v1687_v1 = vpop.xlane.xlu0 %1686 }
 0xb42   : > { %v1688_v2 = vmul.f32 0.03125, %v1687_v1 }
 0xb44   : > { %v1689_v3 = vadd.f32 1e-05, %v1688_v2 }
 0xb46   : > { %1989 = vrsqrt.f32 %v1689_v3 }
 0xb50   : > { %v1990_v4 = vpop.eup %1989 }
 0xb51   : > { %v1691_v5 = vmul.f32 %v1990_v4, %v1683_v62 }
 0xb53   : > { %v1699_v7 = vmul.f32 %v1805_v15, %v1691_v5 }
 0xb55   : > { %v1707_v8 = vadd.f32 %v1806_v6, %v1699_v7 }
 0xb57   : > { %1708 = vst.msk [vmem:[%s452_s22] sm:$0xff] %vm466_vm1, %v1707_v8 }
 0xb58 PF: > { %s23_s25 = sadd.s32 1, %s1997_s25  }
 0xb59   : > { %p20_p4 = scmp.ge.s32.totalorder %s23_s25, 4  }
 0xb5b   :  { %22 = sbr.rel (!%p20_p4) target bundleno = 1 (0x1), region = 105 }

// kernel: transformer_forward.23
= control target key start
LH: loop header
LB: loop body
LE: loop exit
PB: predicated region body
PF: predicated region fallthrough
CT: control target
= control target key end

     0   :  { %s610_s18 = smov 0   ;;  %s612_s19 = smov 0   ;;  %s674_s0 = inlined_call_operand.vmem [shape: f32[16,32], index: 0, kind: input, shape index: {}]   ;;  %s675_s1 = inlined_call_operand.vmem [shape: f32[1,32], index: 1, kind: input, shape index: {}]   ;;  %s676_s2 = inlined_call_operand.vmem [shape: f32[1,32], index: 2, kind: input, shape index: {}]   ;;  %s677_s3 = inlined_call_operand.vmem [shape: f32[32,128], index: 3, kind: input, shape index: {}]   ;;  %s678_s4 = inlined_call_operand.vmem [shape: f32[1,128], index: 4, kind: input, shape index: {}]   ;;  %s679_s5 = inlined_call_operand.vmem [shape: f32[16,128], index: 5, kind: output, shape index: {}]  }
   0x1   :  { %s614_s20 = smov 0  }
   0x2 LB: > { %s27_s21 = sadd.s32 1, %s571_s19  ;;  %p493_p0 = scmp.ge.s32.totalorder %s575_s20, 1  ;;  %s575_s20 = sphi %s614_s20, %s15_s20   ;;  %s571_s19 = sphi %s612_s19, %s681_s19   ;;  %s567_s18 = sphi %s610_s18, %s680_s18  }
   0x3   : > { %p29_p1 = scmp.ge.s32.totalorder %s27_s21, 2  ;;  %p217_p2 = scmp.lt.s32.totalorder %s575_s20, 3 }
   0x5   : > { %s683_s21 = smov (%p29_p1, %s27_s21), 0  ;;  %p218_p3 = pnand %p493_p0, %p217_p2 }
   0x6   : > { %p253_p4 = scmp.lt.s32.totalorder (!%p218_p3), %s567_s18, 1  ;;  %vm272_vm0 = vcmask (!%p218_p3), 261120   ;;  %v303_v7 = vld [vmem:[%s677_s3] sm:$0xff] (!%p218_p3)  ;;  %v304_v8 = vld [vmem:[%s677_s3 + $0x8] sm:$0xff] (!%p218_p3)  ;;  %v305_v9 = vld [vmem:[%s677_s3 + $0x10] sm:$0xff] (!%p218_p3)  ;;  %v577_v10 = vmov (!%p218_p3), 0.0|0.0  }
   0x7   : > { %221 = sbr.rel (%p218_p3) target bundleno = 546 (0x222), region = 40  ;;  %518 = vmatprep.subr.bf16.mxu0 (!%p218_p3), %v577_v10  ;;  %v519_v11 = vpack.c.bf16 (!%p218_p3), %v304_v8, %v303_v7  ;;  %v306_v12 = vld [vmem:[%s677_s3 + $0x18] sm:$0xff] (!%p218_p3)  ;;  %vm578_vm1 = vmmov (!%p218_p3), 0   ;;  %v579_v13 = vmov (!%p218_p3), 0.0   ;;  %v496_v19 = vld [vmem:[%s675_s1] ss:$0 sm:$0xff] (!%p218_p3) }
   0x8   : > { %515 = vmatprep.mubr.msk.f32.mxu0 (!%p218_p3), %vm578_vm1, %v579_v13  ;;  %v522_v14 = vpack.c.bf16 (!%p218_p3), %v306_v12, %v305_v9  ;;  %v497_v21 = vld [vmem:[%s676_s2] ss:$0 sm:$0xff] (!%p218_p3) }
   0x9   : > { %520 = vmatpush3.bf16.msra.mxu0 (!%p218_p3), %v519_v11  ;;  %v498_v24 = vld [vmem:[%s678_s4] ss:$0 sm:$0xff] (!%p218_p3) }
   0xa   : > { %521 = vmatprep.subr.bf16.mxu0 (!%p218_p3), %v577_v10 }
   0xd   : > { %523 = vmatpush3.bf16.msra.mxu0 (!%p218_p3), %v522_v14 }
   0xe   : > { %s685_s18 = smov (!%p253_p4, %s567_s18), 1 }
   0xf   : > { %s494_s22 = sshll.u32 %s685_s18, 3 }
  0x10   : > { %s256_s25 = scalar_lea.vmem %s674_s0, %s494_s22  ;;  %s270_s17 = scalar_lea.vmem %s679_s5, %s494_s22 }
  0x11   : > { %v271_v0 = vld [vmem:[%s256_s25] sm:$0xff] }
  0x12   : > { %v273_v1 = vsel %vm272_vm0, %v271_v0, 0.0 }
  0x13   : > { %274 = vadd.xlane.f32.xlu0 %v273_v1 }
  0xa0   : > { %v275_v2 = vpop.xlane.xlu0 %274 }
  0xa1   : > { %v277_v3 = vmul.f32 0.03125, %v275_v2 }
  0xa3   : > { %v278_v4 = vsub.f32 %v271_v0, %v277_v3 }
  0xa5   : > { %v279_v5 = vmul.f32 %v278_v4, %v278_v4 }
  0xa7   : > { %v280_v6 = vsel %vm272_vm0, %v279_v5, 0.0 }
  0xa8   : > { %281 = vadd.xlane.f32.xlu0 %v280_v6 }
 0x135   : > { %v282_v15 = vpop.xlane.xlu0 %281 }
 0x136   : > { %v283_v16 = vmul.f32 0.03125, %v282_v15 }
 0x138   : > { %v284_v17 = vadd.f32 1e-05, %v283_v16 }
 0x13a   : > { %551 = vrsqrt.f32 %v284_v17 }
 0x144   : > { %v552_v18 = vpop.eup %551 }
 0x145   : > { %v286_v20 = vmul.f32 %v552_v18, %v278_v4 }
 0x147   : > { %v294_v22 = vmul.f32 %v496_v19, %v286_v20 }
 0x149   : > { %v302_v23 = vadd.f32 %v497_v21, %v294_v22 }
 0x14b   : > { %516 = vmatmul.mubr.msk.f32.vlgmr.msra.gmra.mrb[0].mxu0 %vm272_vm0, %v302_v23 }
 0x21e   : > { %v383_v25 = vpop.f32.mrb[0].mxu0 }
 0x21f   : > { %v384_v26 = vadd.f32 %v498_v24, %v383_v25  ;;  %v517_v27 = vpop.f32.mrb[1].mxu0 }
 0x221   : > { %387 = vst [vmem:[%s270_s17] sm:$0xff] %v384_v26 }
 0x222 PF: > { %s15_s20 = sadd.s32 1, %s575_s20   ;;  %s680_s18 = smov %s571_s19 }
 0x223   : > { %p12_p5 = scmp.ge.s32.totalorder %s15_s20, 4   ;;  %s681_s19 = smov %s683_s21 }
 0x225   :  { %14 = sbr.rel (!%p12_p5) target bundleno = 2 (0x2), region = 76 }

</bundles_post_ra>
